<compile_context>
chip_gen: v7x
topology: tpu7x:2x2x1
jax: 0.10.0
libtpu: 0.0.40
codegen_flags: <defaults>
</compile_context>

<pallas_src>
import functools
import math

import jax
import jax.numpy as jnp
from jax.experimental import pallas as pl
from jax.experimental.pallas import tpu as pltpu

EPS = 1e-12
EMB_NORM = True        # cfg['limu_model']['emb_norm']
MATMUL_BF16 = False    # bf16 matmul weights at rest (v5e/v6e/v7x); f32 default

_CPARAMS = pltpu.CompilerParams(
    dimension_semantics=("parallel",),
    vmem_limit_bytes=32 * 1024 * 1024,
)


# --------------------------------------------------------------------------
# In-kernel helpers
# --------------------------------------------------------------------------
def _mm(a, b):
    """MXU matmul with f32 accumulation; bf16 operands iff the weight arrived
    in bf16 (MATMUL_BF16 weights-at-rest path)."""
    if b.dtype == jnp.bfloat16:
        a = a.astype(jnp.bfloat16)
    return jnp.dot(a, b, preferred_element_type=jnp.float32)


def _layernorm(x, gamma, beta):
    """TF-style LayerNorm (epsilon inside the sqrt). Two-pass centered variance
    (matches the PyTorch reference bit-for-bit in structure); rsqrt on the EUP
    instead of divide+sqrt on the VALU."""
    mean = jnp.mean(x, axis=-1, keepdims=True)
    c = x - mean
    var = jnp.mean(c * c, axis=-1, keepdims=True)
    return c * jax.lax.rsqrt(var + EPS) * gamma + beta


def _erf(z):
    # Abramowitz & Stegun 7.1.26 polynomial approximation (|err| < 1.5e-7).
    # Avoids relying on a lax.erf lowering inside Mosaic; only exp/mul/where.
    a1, a2, a3, a4, a5 = 0.254829592, -0.284496736, 1.421413741, -1.453152027, 1.061405429
    p = 0.3275911
    az = jnp.abs(z)
    t = 1.0 / (1.0 + p * az)
    poly = t * (a1 + t * (a2 + t * (a3 + t * (a4 + t * a5))))
    r = 1.0 - poly * jnp.exp(-az * az)
    return jnp.where(z >= 0, r, -r)


def _gelu(x):
    # HuggingFace-style exact gelu: x * 0.5 * (1 + erf(x / sqrt(2)))
    return x * 0.5 * (1.0 + _erf(x * (1.0 / math.sqrt(2.0))))


def _pick_tile_b(batch, seq, target_rows=1024, min_steps=2):
    """Largest whole-sequence row tile such that (a) the row block is a
    multiple of 8 sublanes (or the full batch), (b) it stays at/below ~1024
    rows, and (c) >=2 grid steps remain whenever batch allows it, so the
    "parallel" grid axis can be sharded across v7x's 2 TensorCores."""
    best, best_key = batch, (False, False, 0)
    for d in range(1, batch + 1):
        if batch % d:
            continue
        rows = d * seq
        if rows % 8 != 0 and d != batch:
            continue                      # (8,128) sublane rule when tiling rows
        steps = batch // d
        key = (rows <= max(seq, target_rows),
               steps >= min_steps or batch < min_steps,
               rows)
        if key > best_key:
            best, best_key = d, key
    return best


# --------------------------------------------------------------------------
# One fused kernel: embeddings + n_layers transformer blocks
# --------------------------------------------------------------------------
def limu_fused_kernel(
    x_ref, w_lin_ref, b_lin_ref, pos_ref, ge_ref, be_ref,
    w_qkv_ref, b_qkv_ref, w_proj_ref, b_proj_ref, g1_ref, b1_ref,
    w_fc1_ref, bf1_ref, w_fc2_ref, bf2_ref, g2_ref, b2_ref,
    o_ref, *, n_layers, n_heads, tile_b, seq,
):
    H = b_lin_ref.shape[-1]
    hd = H // n_heads
    T = tile_b * seq
    inv_sqrt_hd = 1.0 / math.sqrt(hd)

    # ---- Embeddings: Linear -> [LN] -> +pos -> LN ----
    ge, be = ge_ref[...], be_ref[...]
    e = _mm(x_ref[...], w_lin_ref[...]) + b_lin_ref[...]
    if EMB_NORM:
        e = _layernorm(e, ge, be)
    # tiles are whole sequences -> broadcast the (S, H) pos table over the tile
    e = (e.reshape(tile_b, seq, H) + pos_ref[...][None]).reshape(T, H)
    h = _layernorm(e, ge, be)

    # ---- hoist the VMEM-resident layer weights (identical every iteration) ----
    w_qkv, b_qkv = w_qkv_ref[...], b_qkv_ref[...]
    w_proj, b_proj = w_proj_ref[...], b_proj_ref[...]
    g1, b1 = g1_ref[...], b1_ref[...]
    w_fc1, bf1 = w_fc1_ref[...], bf1_ref[...]
    w_fc2, bf2 = w_fc2_ref[...], bf2_ref[...]
    g2, b2 = g2_ref[...], b2_ref[...]

    def layer(_, h):
        # fused q/k/v projection: one matmul, 3H-wide (lane-denser) output
        qkv = _mm(h, w_qkv) + b_qkv                                    # (T, 3H)
        q = qkv[:, 0 * H:1 * H].reshape(tile_b, seq, H)
        k = qkv[:, 1 * H:2 * H].reshape(tile_b, seq, H)
        v = qkv[:, 2 * H:3 * H].reshape(tile_b, seq, H)

        # per-head attention, batched over every sequence in the tile;
        # K is contracted in place (no pre-transposed HBM copy).
        outs = []
        for i in range(n_heads):
            sl = slice(i * hd, (i + 1) * hd)
            qh, kh, vh = q[..., sl], k[..., sl], v[..., sl]
            s = jnp.einsum("bqd,bkd->bqk", qh, kh,
                           preferred_element_type=jnp.float32) * inv_sqrt_hd
            s = s - jnp.max(s, axis=-1, keepdims=True)                 # stable softmax
            p = jnp.exp(s)
            denom = jnp.sum(p, axis=-1, keepdims=True)
            # exact reciprocal of the small (tile_b, S, 1) denominator,
            # broadcast-multiplied (approx=True would perturb beyond 2e-4).
            p = p * pl.reciprocal(denom, approx=False)
            outs.append(jnp.einsum("bqk,bkd->bqd", p, vh,
                                   preferred_element_type=jnp.float32))
        a = jnp.concatenate(outs, axis=-1).reshape(T, H)

        # h = LayerNorm1(a + proj(a))
        h = _layernorm(a + _mm(a, w_proj) + b_proj, g1, b1)
        # h = LayerNorm2(h + fc2(gelu(fc1(h))))
        z = _gelu(_mm(h, w_fc1) + bf1)
        h = _layernorm(h + _mm(z, w_fc2) + bf2, g2, b2)
        return h

    h = jax.lax.fori_loop(0, n_layers, layer, h, unroll=True)
    o_ref[...] = h.astype(o_ref.dtype)


# --------------------------------------------------------------------------
# Full model forward (Transformer_Original) — a single pallas_call
# --------------------------------------------------------------------------
def limu_transformer_forward(x, params, *, n_heads, n_layers):
    """x: (B, S, F) float32 -> (B, S, H) float32."""
    B, S, F = x.shape
    H = params["w_lin"].shape[1]
    Dff = params["w_fc1"].shape[1]
    rows = B * S
    tile_b = _pick_tile_b(B, S)
    tile = tile_b * S
    n_steps = B // tile_b

    x2 = x.reshape(rows, F)
    pos = params["pos_table"][:S]                                       # (S, H)

    # Fused q/k/v projection weights -> one matmul, 3H-wide output.
    w_qkv = jnp.concatenate([params["w_q"], params["w_k"], params["w_v"]], axis=1)
    b_qkv = jnp.concatenate([params["b_q"], params["b_k"], params["b_v"]], axis=0)

    def w_at_rest(w):
        # bf16-at-rest matmul weights (halves weight DMA / VMEM, bf16 MXU feed);
        # biases / LN params / all elementwise math stay f32.
        return w.astype(jnp.bfloat16) if MATMUL_BF16 else w

    row1 = lambda v: v.reshape(1, -1)

    operands = (
        x2,
        w_at_rest(params["w_lin"]), row1(params["b_lin"]), pos,
        row1(params["gamma_e"]), row1(params["beta_e"]),
        w_at_rest(w_qkv), row1(b_qkv),
        w_at_rest(params["w_proj"]), row1(params["b_proj"]),
        row1(params["gamma_1"]), row1(params["beta_1"]),
        w_at_rest(params["w_fc1"]), row1(params["b_fc1"]),
        w_at_rest(params["w_fc2"]), row1(params["b_fc2"]),
        row1(params["gamma_2"]), row1(params["beta_2"]),
    )

    # Constant-index_map BlockSpecs -> weights DMA'd once, VMEM-resident.
    const = lambda shape: pl.BlockSpec(shape, lambda i: (0, 0))
    in_specs = [pl.BlockSpec((tile, F), lambda i: (i, 0))] + \
               [const(op.shape) for op in operands[1:]]

    wbytes = int(sum(int(op.size) * op.dtype.itemsize for op in operands[1:]))
    per_row_flops = (2 * F * H + 10 * H
                     + n_layers * (2 * H * 3 * H + 4 * S * H + 2 * H * H
                                   + 4 * H * Dff + 40 * H + 10 * Dff))
    cost = pl.CostEstimate(
        flops=int(rows * per_row_flops),
        transcendentals=int(rows * (2 + n_layers * (n_heads * S + Dff + 2))),
        bytes_accessed=int(4 * rows * (F + H) + wbytes),
    )

    kernel = functools.partial(
        limu_fused_kernel, n_layers=n_layers, n_heads=n_heads,
        tile_b=tile_b, seq=S)

    out = pl.pallas_call(
        kernel,
        out_shape=jax.ShapeDtypeStruct((rows, H), jnp.float32),
        grid_spec=pltpu.PrefetchScalarGridSpec(
            num_scalar_prefetch=0,
            grid=(n_steps,),
            in_specs=in_specs,
            out_specs=pl.BlockSpec((tile, H), lambda i: (i, 0)),
        ),
        compiler_params=_CPARAMS,
        cost_estimate=cost,
    )(*operands)
    return out.reshape(B, S, H)


# --------------------------------------------------------------------------
# Plain-JAX reference mirroring the PyTorch module
# --------------------------------------------------------------------------
def reference_forward(x, params, *, n_heads, n_layers):
    def ln(t, g, b):
        u = jnp.mean(t, axis=-1, keepdims=True)
        s = jnp.mean((t - u) ** 2, axis=-1, keepdims=True)
        return g * (t - u) / jnp.sqrt(s + EPS) + b

    B, S, F = x.shape
    H = params["w_lin"].shape[1]
    hd = H // n_heads

    e = jnp.einsum("bsf,fh->bsh", x, params["w_lin"]) + params["b_lin"]
    if EMB_NORM:
        e = ln(e, params["gamma_e"], params["beta_e"])
    e = e + params["pos_table"][:S][None]
    h = ln(e, params["gamma_e"], params["beta_e"])

    for _ in range(n_layers):
        q = h @ params["w_q"] + params["b_q"]
        k = h @ params["w_k"] + params["b_k"]
        v = h @ params["w_v"] + params["b_v"]

        def heads(t):
            return t.reshape(B, S, n_heads, hd).transpose(0, 2, 1, 3)

        qh, kh, vh = heads(q), heads(k), heads(v)
        sc = jnp.einsum("bhqd,bhkd->bhqk", qh, kh) / math.sqrt(hd)
        sc = jax.nn.softmax(sc, axis=-1)
        a = jnp.einsum("bhqk,bhkd->bhqd", sc, vh).transpose(0, 2, 1, 3).reshape(B, S, H)

        pr = a @ params["w_proj"] + params["b_proj"]
        h = ln(a + pr, params["gamma_1"], params["beta_1"])

        z = h @ params["w_fc1"] + params["b_fc1"]
        z = z * 0.5 * (1.0 + jax.scipy.special.erf(z / math.sqrt(2.0)))
        f = z @ params["w_fc2"] + params["b_fc2"]
        h = ln(h + f, params["gamma_2"], params["beta_2"])
    return h


# --------------------------------------------------------------------------
# Example run
# --------------------------------------------------------------------------
if __name__ == "__main__":
    # Small synthetic config: batch=2, window_size(seq)=8, feat_dim=12,
    # d_hidden=32, n_heads=4, d_ff=64, n_layers=2, emb_norm=True.
    B, S, F, H = 2, 8, 12, 32
    N_HEADS, D_FF, N_LAYERS = 4, 64, 2
    WINDOW_SIZE = 8

    key = jax.random.PRNGKey(0)
    ks = jax.random.split(key, 16)

    x = jax.random.normal(ks[0], (B, S, F), dtype=jnp.float32)

    params = {
        "w_lin": jax.random.normal(ks[1], (F, H), jnp.float32) * 0.1,
        "b_lin": jax.random.normal(ks[2], (H,), jnp.float32) * 0.1,
        "pos_table": jax.random.normal(ks[3], (WINDOW_SIZE, H), jnp.float32) * 0.02,
        "gamma_e": jnp.ones((H,), jnp.float32),
        "beta_e": jnp.zeros((H,), jnp.float32),
        "w_q": jax.random.normal(ks[4], (H, H), jnp.float32) * 0.1,
        "b_q": jax.random.normal(ks[5], (H,), jnp.float32) * 0.1,
        "w_k": jax.random.normal(ks[6], (H, H), jnp.float32) * 0.1,
        "b_k": jax.random.normal(ks[7], (H,), jnp.float32) * 0.1,
        "w_v": jax.random.normal(ks[8], (H, H), jnp.float32) * 0.1,
        "b_v": jax.random.normal(ks[9], (H,), jnp.float32) * 0.1,
        "w_proj": jax.random.normal(ks[10], (H, H), jnp.float32) * 0.1,
        "b_proj": jax.random.normal(ks[11], (H,), jnp.float32) * 0.1,
        "gamma_1": jnp.ones((H,), jnp.float32),
        "beta_1": jnp.zeros((H,), jnp.float32),
        "w_fc1": jax.random.normal(ks[12], (H, D_FF), jnp.float32) * 0.1,
        "b_fc1": jax.random.normal(ks[13], (D_FF,), jnp.float32) * 0.1,
        "w_fc2": jax.random.normal(ks[14], (D_FF, H), jnp.float32) * 0.1,
        "b_fc2": jax.random.normal(ks[15], (H,), jnp.float32) * 0.1,
        "gamma_2": jnp.ones((H,), jnp.float32),
        "beta_2": jnp.zeros((H,), jnp.float32),
    }

    fwd = jax.jit(lambda inp: limu_transformer_forward(
        inp, params, n_heads=N_HEADS, n_layers=N_LAYERS))
    out = jax.block_until_ready(fwd(x))

    ref = reference_forward(x, params, n_heads=N_HEADS, n_layers=N_LAYERS)

    assert out.shape == (B, S, H)
    assert jnp.allclose(out, ref, atol=2e-4, rtol=2e-4), "mismatch vs reference"

    print("KERNEL_OK")
</pallas_src>

<mosaic_0001>
module attributes {stable_mosaic.version = 11 : i64} {
  func.func @limu_fused_kernel(%arg0: i32, %arg1: memref<8x12xf32, #tpu.memory_space<vmem>>, %arg2: memref<12x32xf32, #tpu.memory_space<vmem>>, %arg3: memref<1x32xf32, #tpu.memory_space<vmem>>, %arg4: memref<8x32xf32, #tpu.memory_space<vmem>>, %arg5: memref<1x32xf32, #tpu.memory_space<vmem>>, %arg6: memref<1x32xf32, #tpu.memory_space<vmem>>, %arg7: memref<32x96xf32, #tpu.memory_space<vmem>>, %arg8: memref<1x96xf32, #tpu.memory_space<vmem>>, %arg9: memref<32x32xf32, #tpu.memory_space<vmem>>, %arg10: memref<1x32xf32, #tpu.memory_space<vmem>>, %arg11: memref<1x32xf32, #tpu.memory_space<vmem>>, %arg12: memref<1x32xf32, #tpu.memory_space<vmem>>, %arg13: memref<32x64xf32, #tpu.memory_space<vmem>>, %arg14: memref<1x64xf32, #tpu.memory_space<vmem>>, %arg15: memref<64x32xf32, #tpu.memory_space<vmem>>, %arg16: memref<1x32xf32, #tpu.memory_space<vmem>>, %arg17: memref<1x32xf32, #tpu.memory_space<vmem>>, %arg18: memref<1x32xf32, #tpu.memory_space<vmem>>, %arg19: memref<8x32xf32, #tpu.memory_space<vmem>>) attributes {dimension_semantics = [#tpu.dimension_semantics<parallel>], iteration_bounds = array<i64: 2>, scalar_prefetch = 0 : i64, scratch_operands = 0 : i64, tpu.core_type = #tpu.core_type<tc>, window_params = [{transform_indices = @transform_0, window_bounds = array<i64: 8, 12>}, {pipeline_mode = #tpu.pipeline_mode<synchronous>, transform_indices = @transform_1, window_bounds = array<i64: 12, 32>}, {pipeline_mode = #tpu.pipeline_mode<synchronous>, transform_indices = @transform_2, window_bounds = array<i64: 1, 32>}, {pipeline_mode = #tpu.pipeline_mode<synchronous>, transform_indices = @transform_3, window_bounds = array<i64: 8, 32>}, {pipeline_mode = #tpu.pipeline_mode<synchronous>, transform_indices = @transform_4, window_bounds = array<i64: 1, 32>}, {pipeline_mode = #tpu.pipeline_mode<synchronous>, transform_indices = @transform_5, window_bounds = array<i64: 1, 32>}, {pipeline_mode = #tpu.pipeline_mode<synchronous>, transform_indices = @transform_6, window_bounds = array<i64: 32, 96>}, {pipeline_mode = #tpu.pipeline_mode<synchronous>, transform_indices = @transform_7, window_bounds = array<i64: 1, 96>}, {pipeline_mode = #tpu.pipeline_mode<synchronous>, transform_indices = @transform_8, window_bounds = array<i64: 32, 32>}, {pipeline_mode = #tpu.pipeline_mode<synchronous>, transform_indices = @transform_9, window_bounds = array<i64: 1, 32>}, {pipeline_mode = #tpu.pipeline_mode<synchronous>, transform_indices = @transform_10, window_bounds = array<i64: 1, 32>}, {pipeline_mode = #tpu.pipeline_mode<synchronous>, transform_indices = @transform_11, window_bounds = array<i64: 1, 32>}, {pipeline_mode = #tpu.pipeline_mode<synchronous>, transform_indices = @transform_12, window_bounds = array<i64: 32, 64>}, {pipeline_mode = #tpu.pipeline_mode<synchronous>, transform_indices = @transform_13, window_bounds = array<i64: 1, 64>}, {pipeline_mode = #tpu.pipeline_mode<synchronous>, transform_indices = @transform_14, window_bounds = array<i64: 64, 32>}, {pipeline_mode = #tpu.pipeline_mode<synchronous>, transform_indices = @transform_15, window_bounds = array<i64: 1, 32>}, {pipeline_mode = #tpu.pipeline_mode<synchronous>, transform_indices = @transform_16, window_bounds = array<i64: 1, 32>}, {pipeline_mode = #tpu.pipeline_mode<synchronous>, transform_indices = @transform_17, window_bounds = array<i64: 1, 32>}, {transform_indices = @transform_18, window_bounds = array<i64: 8, 32>}]} {
    %c0 = arith.constant 0 : index
    %c0_0 = arith.constant 0 : index
    %0 = vector.load %arg5[%c0, %c0_0] : memref<1x32xf32, #tpu.memory_space<vmem>>, vector<1x32xf32>
    %c0_1 = arith.constant 0 : index
    %c0_2 = arith.constant 0 : index
    %1 = vector.load %arg6[%c0_1, %c0_2] : memref<1x32xf32, #tpu.memory_space<vmem>>, vector<1x32xf32>
    %c0_3 = arith.constant 0 : index
    %c0_4 = arith.constant 0 : index
    %2 = vector.load %arg1[%c0_3, %c0_4] : memref<8x12xf32, #tpu.memory_space<vmem>>, vector<8x12xf32>
    %c0_5 = arith.constant 0 : index
    %c0_6 = arith.constant 0 : index
    %3 = vector.load %arg2[%c0_5, %c0_6] : memref<12x32xf32, #tpu.memory_space<vmem>>, vector<12x32xf32>
    %cst = arith.constant dense<0.000000e+00> : vector<8x32xf32>
    %4 = tpu.matmul %2, %3, %cst {dimension_numbers = #tpu.dot_dimension_numbers<[1], [0], [0], [1], [0, 0, 1, 1], [], []>} : vector<8x12xf32>, vector<12x32xf32>, vector<8x32xf32> -> vector<8x32xf32>
    %c0_7 = arith.constant 0 : index
    %c0_8 = arith.constant 0 : index
    %5 = vector.load %arg3[%c0_7, %c0_8] : memref<1x32xf32, #tpu.memory_space<vmem>>, vector<1x32xf32>
    %6 = vector.broadcast %5 : vector<1x32xf32> to vector<8x32xf32>
    %7 = arith.addf %4, %6 : vector<8x32xf32>
    %cst_9 = arith.constant dense<0.000000e+00> : vector<8xf32>
    %8 = vector.multi_reduction <add>, %7, %cst_9 [1] : vector<8x32xf32> to vector<8xf32>
    %9 = vector.shape_cast %8 : vector<8xf32> to vector<8x1xf32>
    %cst_10 = arith.constant 3.200000e+01 : f32
    %10 = vector.broadcast %cst_10 : f32 to vector<8x1xf32>
    %11 = arith.divf %9, %10 : vector<8x1xf32>
    %12 = vector.broadcast %11 : vector<8x1xf32> to vector<8x32xf32>
    %13 = arith.subf %7, %12 : vector<8x32xf32>
    %14 = arith.mulf %13, %13 : vector<8x32xf32>
    %cst_11 = arith.constant dense<0.000000e+00> : vector<8xf32>
    %15 = vector.multi_reduction <add>, %14, %cst_11 [1] : vector<8x32xf32> to vector<8xf32>
    %16 = vector.shape_cast %15 : vector<8xf32> to vector<8x1xf32>
    %cst_12 = arith.constant 3.200000e+01 : f32
    %17 = vector.broadcast %cst_12 : f32 to vector<8x1xf32>
    %18 = arith.divf %16, %17 : vector<8x1xf32>
    %cst_13 = arith.constant 9.99999996E-13 : f32
    %19 = vector.broadcast %cst_13 : f32 to vector<8x1xf32>
    %20 = arith.addf %18, %19 : vector<8x1xf32>
    %21 = math.rsqrt %20 : vector<8x1xf32>
    %22 = vector.broadcast %21 : vector<8x1xf32> to vector<8x32xf32>
    %23 = arith.mulf %13, %22 : vector<8x32xf32>
    %24 = vector.broadcast %0 : vector<1x32xf32> to vector<8x32xf32>
    %25 = arith.mulf %23, %24 : vector<8x32xf32>
    %26 = vector.broadcast %1 : vector<1x32xf32> to vector<8x32xf32>
    %27 = arith.addf %25, %26 : vector<8x32xf32>
    %28 = vector.shape_cast %27 : vector<8x32xf32> to vector<1x8x32xf32>
    %c0_14 = arith.constant 0 : index
    %c0_15 = arith.constant 0 : index
    %29 = vector.load %arg4[%c0_14, %c0_15] : memref<8x32xf32, #tpu.memory_space<vmem>>, vector<8x32xf32>
    %30 = vector.shape_cast %29 : vector<8x32xf32> to vector<1x8x32xf32>
    %31 = arith.addf %28, %30 : vector<1x8x32xf32>
    %32 = vector.shape_cast %31 : vector<1x8x32xf32> to vector<8x32xf32>
    %cst_16 = arith.constant dense<0.000000e+00> : vector<8xf32>
    %33 = vector.multi_reduction <add>, %32, %cst_16 [1] : vector<8x32xf32> to vector<8xf32>
    %34 = vector.shape_cast %33 : vector<8xf32> to vector<8x1xf32>
    %cst_17 = arith.constant 3.200000e+01 : f32
    %35 = vector.broadcast %cst_17 : f32 to vector<8x1xf32>
    %36 = arith.divf %34, %35 : vector<8x1xf32>
    %37 = vector.broadcast %36 : vector<8x1xf32> to vector<8x32xf32>
    %38 = arith.subf %32, %37 : vector<8x32xf32>
    %39 = arith.mulf %38, %38 : vector<8x32xf32>
    %cst_18 = arith.constant dense<0.000000e+00> : vector<8xf32>
    %40 = vector.multi_reduction <add>, %39, %cst_18 [1] : vector<8x32xf32> to vector<8xf32>
    %41 = vector.shape_cast %40 : vector<8xf32> to vector<8x1xf32>
    %cst_19 = arith.constant 3.200000e+01 : f32
    %42 = vector.broadcast %cst_19 : f32 to vector<8x1xf32>
    %43 = arith.divf %41, %42 : vector<8x1xf32>
    %cst_20 = arith.constant 9.99999996E-13 : f32
    %44 = vector.broadcast %cst_20 : f32 to vector<8x1xf32>
    %45 = arith.addf %43, %44 : vector<8x1xf32>
    %46 = math.rsqrt %45 : vector<8x1xf32>
    %47 = vector.broadcast %46 : vector<8x1xf32> to vector<8x32xf32>
    %48 = arith.mulf %38, %47 : vector<8x32xf32>
    %49 = vector.broadcast %0 : vector<1x32xf32> to vector<8x32xf32>
    %50 = arith.mulf %48, %49 : vector<8x32xf32>
    %51 = vector.broadcast %1 : vector<1x32xf32> to vector<8x32xf32>
    %52 = arith.addf %50, %51 : vector<8x32xf32>
    %c0_21 = arith.constant 0 : index
    %c0_22 = arith.constant 0 : index
    %53 = vector.load %arg7[%c0_21, %c0_22] : memref<32x96xf32, #tpu.memory_space<vmem>>, vector<32x96xf32>
    %c0_23 = arith.constant 0 : index
    %c0_24 = arith.constant 0 : index
    %54 = vector.load %arg8[%c0_23, %c0_24] : memref<1x96xf32, #tpu.memory_space<vmem>>, vector<1x96xf32>
    %c0_25 = arith.constant 0 : index
    %c0_26 = arith.constant 0 : index
    %55 = vector.load %arg9[%c0_25, %c0_26] : memref<32x32xf32, #tpu.memory_space<vmem>>, vector<32x32xf32>
    %c0_27 = arith.constant 0 : index
    %c0_28 = arith.constant 0 : index
    %56 = vector.load %arg10[%c0_27, %c0_28] : memref<1x32xf32, #tpu.memory_space<vmem>>, vector<1x32xf32>
    %c0_29 = arith.constant 0 : index
    %c0_30 = arith.constant 0 : index
    %57 = vector.load %arg11[%c0_29, %c0_30] : memref<1x32xf32, #tpu.memory_space<vmem>>, vector<1x32xf32>
    %c0_31 = arith.constant 0 : index
    %c0_32 = arith.constant 0 : index
    %58 = vector.load %arg12[%c0_31, %c0_32] : memref<1x32xf32, #tpu.memory_space<vmem>>, vector<1x32xf32>
    %c0_33 = arith.constant 0 : index
    %c0_34 = arith.constant 0 : index
    %59 = vector.load %arg13[%c0_33, %c0_34] : memref<32x64xf32, #tpu.memory_space<vmem>>, vector<32x64xf32>
    %c0_35 = arith.constant 0 : index
    %c0_36 = arith.constant 0 : index
    %60 = vector.load %arg14[%c0_35, %c0_36] : memref<1x64xf32, #tpu.memory_space<vmem>>, vector<1x64xf32>
    %c0_37 = arith.constant 0 : index
    %c0_38 = arith.constant 0 : index
    %61 = vector.load %arg15[%c0_37, %c0_38] : memref<64x32xf32, #tpu.memory_space<vmem>>, vector<64x32xf32>
    %c0_39 = arith.constant 0 : index
    %c0_40 = arith.constant 0 : index
    %62 = vector.load %arg16[%c0_39, %c0_40] : memref<1x32xf32, #tpu.memory_space<vmem>>, vector<1x32xf32>
    %c0_41 = arith.constant 0 : index
    %c0_42 = arith.constant 0 : index
    %63 = vector.load %arg17[%c0_41, %c0_42] : memref<1x32xf32, #tpu.memory_space<vmem>>, vector<1x32xf32>
    %c0_43 = arith.constant 0 : index
    %c0_44 = arith.constant 0 : index
    %64 = vector.load %arg18[%c0_43, %c0_44] : memref<1x32xf32, #tpu.memory_space<vmem>>, vector<1x32xf32>
    %c0_i32 = arith.constant 0 : i32
    %cst_45 = arith.constant dense<0.000000e+00> : vector<8x96xf32>
    %65 = tpu.matmul %52, %53, %cst_45 {dimension_numbers = #tpu.dot_dimension_numbers<[1], [0], [0], [1], [0, 0, 1, 1], [], []>} : vector<8x32xf32>, vector<32x96xf32>, vector<8x96xf32> -> vector<8x96xf32>
    %66 = vector.broadcast %54 : vector<1x96xf32> to vector<8x96xf32>
    %67 = arith.addf %65, %66 : vector<8x96xf32>
    %68 = vector.extract_strided_slice %67 {offsets = [0, 0], sizes = [8, 32], strides = [1, 1]} : vector<8x96xf32> to vector<8x32xf32>
    %69 = vector.shape_cast %68 : vector<8x32xf32> to vector<1x8x32xf32>
    %70 = vector.extract_strided_slice %67 {offsets = [0, 32], sizes = [8, 32], strides = [1, 1]} : vector<8x96xf32> to vector<8x32xf32>
    %71 = vector.shape_cast %70 : vector<8x32xf32> to vector<1x8x32xf32>
    %72 = vector.extract_strided_slice %67 {offsets = [0, 64], sizes = [8, 32], strides = [1, 1]} : vector<8x96xf32> to vector<8x32xf32>
    %73 = vector.shape_cast %72 : vector<8x32xf32> to vector<1x8x32xf32>
    %74 = vector.extract_strided_slice %69 {offsets = [0, 0, 0], sizes = [1, 8, 8], strides = [1, 1, 1]} : vector<1x8x32xf32> to vector<1x8x8xf32>
    %75 = vector.extract_strided_slice %71 {offsets = [0, 0, 0], sizes = [1, 8, 8], strides = [1, 1, 1]} : vector<1x8x32xf32> to vector<1x8x8xf32>
    %76 = vector.extract_strided_slice %73 {offsets = [0, 0, 0], sizes = [1, 8, 8], strides = [1, 1, 1]} : vector<1x8x32xf32> to vector<1x8x8xf32>
    "tpu.trace_start"() <{level = 10 : i32, message = "bqd,bkd->bqk"}> : () -> ()
    %cst_46 = arith.constant dense<0.000000e+00> : vector<1x8x8xf32>
    %77 = tpu.matmul %74, %75, %cst_46 {dimension_numbers = #tpu.dot_dimension_numbers<[2], [2], [1], [1], [0, 0, 0, 1, 1, 1], [0], [0]>} : vector<1x8x8xf32>, vector<1x8x8xf32>, vector<1x8x8xf32> -> vector<1x8x8xf32>
    "tpu.trace_stop"() : () -> ()
    %cst_47 = arith.constant 0.353553385 : f32
    %78 = vector.broadcast %cst_47 : f32 to vector<1x8x8xf32>
    %79 = arith.mulf %77, %78 : vector<1x8x8xf32>
    %cst_48 = arith.constant dense<0xFF800000> : vector<1x8xf32>
    %80 = vector.multi_reduction <maximumf>, %79, %cst_48 [2] : vector<1x8x8xf32> to vector<1x8xf32>
    %81 = vector.shape_cast %80 : vector<1x8xf32> to vector<1x8x1xf32>
    %82 = vector.broadcast %81 : vector<1x8x1xf32> to vector<1x8x8xf32>
    %83 = arith.subf %79, %82 : vector<1x8x8xf32>
    %84 = math.exp %83 : vector<1x8x8xf32>
    %cst_49 = arith.constant dense<0.000000e+00> : vector<1x8xf32>
    %85 = vector.multi_reduction <add>, %84, %cst_49 [2] : vector<1x8x8xf32> to vector<1x8xf32>
    %86 = vector.shape_cast %85 : vector<1x8xf32> to vector<1x8x1xf32>
    %87 = tpu.reciprocal %86 : vector<1x8x1xf32> -> vector<1x8x1xf32>
    %88 = vector.broadcast %87 : vector<1x8x1xf32> to vector<1x8x8xf32>
    %89 = arith.mulf %84, %88 : vector<1x8x8xf32>
    "tpu.trace_start"() <{level = 10 : i32, message = "bqk,bkd->bqd"}> : () -> ()
    %cst_50 = arith.constant dense<0.000000e+00> : vector<1x8x8xf32>
    %90 = tpu.matmul %89, %76, %cst_50 {dimension_numbers = #tpu.dot_dimension_numbers<[2], [1], [1], [2], [0, 0, 0, 1, 1, 2], [0], [0]>} : vector<1x8x8xf32>, vector<1x8x8xf32>, vector<1x8x8xf32> -> vector<1x8x8xf32>
    "tpu.trace_stop"() : () -> ()
    %91 = vector.extract_strided_slice %69 {offsets = [0, 0, 8], sizes = [1, 8, 8], strides = [1, 1, 1]} : vector<1x8x32xf32> to vector<1x8x8xf32>
    %92 = vector.extract_strided_slice %71 {offsets = [0, 0, 8], sizes = [1, 8, 8], strides = [1, 1, 1]} : vector<1x8x32xf32> to vector<1x8x8xf32>
    %93 = vector.extract_strided_slice %73 {offsets = [0, 0, 8], sizes = [1, 8, 8], strides = [1, 1, 1]} : vector<1x8x32xf32> to vector<1x8x8xf32>
    "tpu.trace_start"() <{level = 10 : i32, message = "bqd,bkd->bqk"}> : () -> ()
    %cst_51 = arith.constant dense<0.000000e+00> : vector<1x8x8xf32>
    %94 = tpu.matmul %91, %92, %cst_51 {dimension_numbers = #tpu.dot_dimension_numbers<[2], [2], [1], [1], [0, 0, 0, 1, 1, 1], [0], [0]>} : vector<1x8x8xf32>, vector<1x8x8xf32>, vector<1x8x8xf32> -> vector<1x8x8xf32>
    "tpu.trace_stop"() : () -> ()
    %cst_52 = arith.constant 0.353553385 : f32
    %95 = vector.broadcast %cst_52 : f32 to vector<1x8x8xf32>
    %96 = arith.mulf %94, %95 : vector<1x8x8xf32>
    %cst_53 = arith.constant dense<0xFF800000> : vector<1x8xf32>
    %97 = vector.multi_reduction <maximumf>, %96, %cst_53 [2] : vector<1x8x8xf32> to vector<1x8xf32>
    %98 = vector.shape_cast %97 : vector<1x8xf32> to vector<1x8x1xf32>
    %99 = vector.broadcast %98 : vector<1x8x1xf32> to vector<1x8x8xf32>
    %100 = arith.subf %96, %99 : vector<1x8x8xf32>
    %101 = math.exp %100 : vector<1x8x8xf32>
    %cst_54 = arith.constant dense<0.000000e+00> : vector<1x8xf32>
    %102 = vector.multi_reduction <add>, %101, %cst_54 [2] : vector<1x8x8xf32> to vector<1x8xf32>
    %103 = vector.shape_cast %102 : vector<1x8xf32> to vector<1x8x1xf32>
    %104 = tpu.reciprocal %103 : vector<1x8x1xf32> -> vector<1x8x1xf32>
    %105 = vector.broadcast %104 : vector<1x8x1xf32> to vector<1x8x8xf32>
    %106 = arith.mulf %101, %105 : vector<1x8x8xf32>
    "tpu.trace_start"() <{level = 10 : i32, message = "bqk,bkd->bqd"}> : () -> ()
    %cst_55 = arith.constant dense<0.000000e+00> : vector<1x8x8xf32>
    %107 = tpu.matmul %106, %93, %cst_55 {dimension_numbers = #tpu.dot_dimension_numbers<[2], [1], [1], [2], [0, 0, 0, 1, 1, 2], [0], [0]>} : vector<1x8x8xf32>, vector<1x8x8xf32>, vector<1x8x8xf32> -> vector<1x8x8xf32>
    "tpu.trace_stop"() : () -> ()
    %108 = vector.extract_strided_slice %69 {offsets = [0, 0, 16], sizes = [1, 8, 8], strides = [1, 1, 1]} : vector<1x8x32xf32> to vector<1x8x8xf32>
    %109 = vector.extract_strided_slice %71 {offsets = [0, 0, 16], sizes = [1, 8, 8], strides = [1, 1, 1]} : vector<1x8x32xf32> to vector<1x8x8xf32>
    %110 = vector.extract_strided_slice %73 {offsets = [0, 0, 16], sizes = [1, 8, 8], strides = [1, 1, 1]} : vector<1x8x32xf32> to vector<1x8x8xf32>
    "tpu.trace_start"() <{level = 10 : i32, message = "bqd,bkd->bqk"}> : () -> ()
    %cst_56 = arith.constant dense<0.000000e+00> : vector<1x8x8xf32>
    %111 = tpu.matmul %108, %109, %cst_56 {dimension_numbers = #tpu.dot_dimension_numbers<[2], [2], [1], [1], [0, 0, 0, 1, 1, 1], [0], [0]>} : vector<1x8x8xf32>, vector<1x8x8xf32>, vector<1x8x8xf32> -> vector<1x8x8xf32>
    "tpu.trace_stop"() : () -> ()
    %cst_57 = arith.constant 0.353553385 : f32
    %112 = vector.broadcast %cst_57 : f32 to vector<1x8x8xf32>
    %113 = arith.mulf %111, %112 : vector<1x8x8xf32>
    %cst_58 = arith.constant dense<0xFF800000> : vector<1x8xf32>
    %114 = vector.multi_reduction <maximumf>, %113, %cst_58 [2] : vector<1x8x8xf32> to vector<1x8xf32>
    %115 = vector.shape_cast %114 : vector<1x8xf32> to vector<1x8x1xf32>
    %116 = vector.broadcast %115 : vector<1x8x1xf32> to vector<1x8x8xf32>
    %117 = arith.subf %113, %116 : vector<1x8x8xf32>
    %118 = math.exp %117 : vector<1x8x8xf32>
    %cst_59 = arith.constant dense<0.000000e+00> : vector<1x8xf32>
    %119 = vector.multi_reduction <add>, %118, %cst_59 [2] : vector<1x8x8xf32> to vector<1x8xf32>
    %120 = vector.shape_cast %119 : vector<1x8xf32> to vector<1x8x1xf32>
    %121 = tpu.reciprocal %120 : vector<1x8x1xf32> -> vector<1x8x1xf32>
    %122 = vector.broadcast %121 : vector<1x8x1xf32> to vector<1x8x8xf32>
    %123 = arith.mulf %118, %122 : vector<1x8x8xf32>
    "tpu.trace_start"() <{level = 10 : i32, message = "bqk,bkd->bqd"}> : () -> ()
    %cst_60 = arith.constant dense<0.000000e+00> : vector<1x8x8xf32>
    %124 = tpu.matmul %123, %110, %cst_60 {dimension_numbers = #tpu.dot_dimension_numbers<[2], [1], [1], [2], [0, 0, 0, 1, 1, 2], [0], [0]>} : vector<1x8x8xf32>, vector<1x8x8xf32>, vector<1x8x8xf32> -> vector<1x8x8xf32>
    "tpu.trace_stop"() : () -> ()
    %125 = vector.extract_strided_slice %69 {offsets = [0, 0, 24], sizes = [1, 8, 8], strides = [1, 1, 1]} : vector<1x8x32xf32> to vector<1x8x8xf32>
    %126 = vector.extract_strided_slice %71 {offsets = [0, 0, 24], sizes = [1, 8, 8], strides = [1, 1, 1]} : vector<1x8x32xf32> to vector<1x8x8xf32>
    %127 = vector.extract_strided_slice %73 {offsets = [0, 0, 24], sizes = [1, 8, 8], strides = [1, 1, 1]} : vector<1x8x32xf32> to vector<1x8x8xf32>
    "tpu.trace_start"() <{level = 10 : i32, message = "bqd,bkd->bqk"}> : () -> ()
    %cst_61 = arith.constant dense<0.000000e+00> : vector<1x8x8xf32>
    %128 = tpu.matmul %125, %126, %cst_61 {dimension_numbers = #tpu.dot_dimension_numbers<[2], [2], [1], [1], [0, 0, 0, 1, 1, 1], [0], [0]>} : vector<1x8x8xf32>, vector<1x8x8xf32>, vector<1x8x8xf32> -> vector<1x8x8xf32>
    "tpu.trace_stop"() : () -> ()
    %cst_62 = arith.constant 0.353553385 : f32
    %129 = vector.broadcast %cst_62 : f32 to vector<1x8x8xf32>
    %130 = arith.mulf %128, %129 : vector<1x8x8xf32>
    %cst_63 = arith.constant dense<0xFF800000> : vector<1x8xf32>
    %131 = vector.multi_reduction <maximumf>, %130, %cst_63 [2] : vector<1x8x8xf32> to vector<1x8xf32>
    %132 = vector.shape_cast %131 : vector<1x8xf32> to vector<1x8x1xf32>
    %133 = vector.broadcast %132 : vector<1x8x1xf32> to vector<1x8x8xf32>
    %134 = arith.subf %130, %133 : vector<1x8x8xf32>
    %135 = math.exp %134 : vector<1x8x8xf32>
    %cst_64 = arith.constant dense<0.000000e+00> : vector<1x8xf32>
    %136 = vector.multi_reduction <add>, %135, %cst_64 [2] : vector<1x8x8xf32> to vector<1x8xf32>
    %137 = vector.shape_cast %136 : vector<1x8xf32> to vector<1x8x1xf32>
    %138 = tpu.reciprocal %137 : vector<1x8x1xf32> -> vector<1x8x1xf32>
    %139 = vector.broadcast %138 : vector<1x8x1xf32> to vector<1x8x8xf32>
    %140 = arith.mulf %135, %139 : vector<1x8x8xf32>
    "tpu.trace_start"() <{level = 10 : i32, message = "bqk,bkd->bqd"}> : () -> ()
    %cst_65 = arith.constant dense<0.000000e+00> : vector<1x8x8xf32>
    %141 = tpu.matmul %140, %127, %cst_65 {dimension_numbers = #tpu.dot_dimension_numbers<[2], [1], [1], [2], [0, 0, 0, 1, 1, 2], [0], [0]>} : vector<1x8x8xf32>, vector<1x8x8xf32>, vector<1x8x8xf32> -> vector<1x8x8xf32>
    "tpu.trace_stop"() : () -> ()
    %142 = tpu.concatenate %90, %107, %124, %141 in 2 : vector<1x8x8xf32>, vector<1x8x8xf32>, vector<1x8x8xf32>, vector<1x8x8xf32> -> vector<1x8x32xf32>
    %143 = vector.shape_cast %142 : vector<1x8x32xf32> to vector<8x32xf32>
    %cst_66 = arith.constant dense<0.000000e+00> : vector<8x32xf32>
    %144 = tpu.matmul %143, %55, %cst_66 {dimension_numbers = #tpu.dot_dimension_numbers<[1], [0], [0], [1], [0, 0, 1, 1], [], []>} : vector<8x32xf32>, vector<32x32xf32>, vector<8x32xf32> -> vector<8x32xf32>
    %145 = arith.addf %143, %144 : vector<8x32xf32>
    %146 = vector.broadcast %56 : vector<1x32xf32> to vector<8x32xf32>
    %147 = arith.addf %145, %146 : vector<8x32xf32>
    %cst_67 = arith.constant dense<0.000000e+00> : vector<8xf32>
    %148 = vector.multi_reduction <add>, %147, %cst_67 [1] : vector<8x32xf32> to vector<8xf32>
    %149 = vector.shape_cast %148 : vector<8xf32> to vector<8x1xf32>
    %cst_68 = arith.constant 3.200000e+01 : f32
    %150 = vector.broadcast %cst_68 : f32 to vector<8x1xf32>
    %151 = arith.divf %149, %150 : vector<8x1xf32>
    %152 = vector.broadcast %151 : vector<8x1xf32> to vector<8x32xf32>
    %153 = arith.subf %147, %152 : vector<8x32xf32>
    %154 = arith.mulf %153, %153 : vector<8x32xf32>
    %cst_69 = arith.constant dense<0.000000e+00> : vector<8xf32>
    %155 = vector.multi_reduction <add>, %154, %cst_69 [1] : vector<8x32xf32> to vector<8xf32>
    %156 = vector.shape_cast %155 : vector<8xf32> to vector<8x1xf32>
    %cst_70 = arith.constant 3.200000e+01 : f32
    %157 = vector.broadcast %cst_70 : f32 to vector<8x1xf32>
    %158 = arith.divf %156, %157 : vector<8x1xf32>
    %cst_71 = arith.constant 9.99999996E-13 : f32
    %159 = vector.broadcast %cst_71 : f32 to vector<8x1xf32>
    %160 = arith.addf %158, %159 : vector<8x1xf32>
    %161 = math.rsqrt %160 : vector<8x1xf32>
    %162 = vector.broadcast %161 : vector<8x1xf32> to vector<8x32xf32>
    %163 = arith.mulf %153, %162 : vector<8x32xf32>
    %164 = vector.broadcast %57 : vector<1x32xf32> to vector<8x32xf32>
    %165 = arith.mulf %163, %164 : vector<8x32xf32>
    %166 = vector.broadcast %58 : vector<1x32xf32> to vector<8x32xf32>
    %167 = arith.addf %165, %166 : vector<8x32xf32>
    %cst_72 = arith.constant dense<0.000000e+00> : vector<8x64xf32>
    %168 = tpu.matmul %167, %59, %cst_72 {dimension_numbers = #tpu.dot_dimension_numbers<[1], [0], [0], [1], [0, 0, 1, 1], [], []>} : vector<8x32xf32>, vector<32x64xf32>, vector<8x64xf32> -> vector<8x64xf32>
    %169 = vector.broadcast %60 : vector<1x64xf32> to vector<8x64xf32>
    %170 = arith.addf %168, %169 : vector<8x64xf32>
    %cst_73 = arith.constant 5.000000e-01 : f32
    %171 = vector.broadcast %cst_73 : f32 to vector<8x64xf32>
    %172 = arith.mulf %170, %171 : vector<8x64xf32>
    %cst_74 = arith.constant 0.707106769 : f32
    %173 = vector.broadcast %cst_74 : f32 to vector<8x64xf32>
    %174 = arith.mulf %170, %173 : vector<8x64xf32>
    %175 = math.absf %174 : vector<8x64xf32>
    %cst_75 = arith.constant 0.327591091 : f32
    %176 = vector.broadcast %cst_75 : f32 to vector<8x64xf32>
    %177 = arith.mulf %176, %175 : vector<8x64xf32>
    %cst_76 = arith.constant 1.000000e+00 : f32
    %178 = vector.broadcast %cst_76 : f32 to vector<8x64xf32>
    %179 = arith.addf %178, %177 : vector<8x64xf32>
    %cst_77 = arith.constant 1.000000e+00 : f32
    %180 = vector.broadcast %cst_77 : f32 to vector<8x64xf32>
    %181 = arith.divf %180, %179 : vector<8x64xf32>
    %cst_78 = arith.constant 1.06140542 : f32
    %182 = vector.broadcast %cst_78 : f32 to vector<8x64xf32>
    %183 = arith.mulf %181, %182 : vector<8x64xf32>
    %cst_79 = arith.constant -1.45315206 : f32
    %184 = vector.broadcast %cst_79 : f32 to vector<8x64xf32>
    %185 = arith.addf %184, %183 : vector<8x64xf32>
    %186 = arith.mulf %181, %185 : vector<8x64xf32>
    %cst_80 = arith.constant 1.42141378 : f32
    %187 = vector.broadcast %cst_80 : f32 to vector<8x64xf32>
    %188 = arith.addf %187, %186 : vector<8x64xf32>
    %189 = arith.mulf %181, %188 : vector<8x64xf32>
    %cst_81 = arith.constant -0.284496725 : f32
    %190 = vector.broadcast %cst_81 : f32 to vector<8x64xf32>
    %191 = arith.addf %190, %189 : vector<8x64xf32>
    %192 = arith.mulf %181, %191 : vector<8x64xf32>
    %cst_82 = arith.constant 0.254829586 : f32
    %193 = vector.broadcast %cst_82 : f32 to vector<8x64xf32>
    %194 = arith.addf %193, %192 : vector<8x64xf32>
    %195 = arith.mulf %181, %194 : vector<8x64xf32>
    %cst_83 = arith.constant 0.000000e+00 : f32
    %196 = vector.broadcast %cst_83 : f32 to vector<8x64xf32>
    %197 = arith.subf %196, %175 : vector<8x64xf32>
    %198 = arith.mulf %197, %175 : vector<8x64xf32>
    %199 = math.exp %198 : vector<8x64xf32>
    %200 = arith.mulf %195, %199 : vector<8x64xf32>
    %cst_84 = arith.constant 1.000000e+00 : f32
    %201 = vector.broadcast %cst_84 : f32 to vector<8x64xf32>
    %202 = arith.subf %201, %200 : vector<8x64xf32>
    %cst_85 = arith.constant 0.000000e+00 : f32
    %203 = vector.broadcast %cst_85 : f32 to vector<8x64xf32>
    %204 = arith.cmpf oge, %174, %203 : vector<8x64xf32>
    %cst_86 = arith.constant 0.000000e+00 : f32
    %205 = vector.broadcast %cst_86 : f32 to vector<8x64xf32>
    %206 = arith.subf %205, %202 : vector<8x64xf32>
    %207 = arith.select %204, %202, %206 : vector<8x64xi1>, vector<8x64xf32>
    %cst_87 = arith.constant 1.000000e+00 : f32
    %208 = vector.broadcast %cst_87 : f32 to vector<8x64xf32>
    %209 = arith.addf %208, %207 : vector<8x64xf32>
    %210 = arith.mulf %172, %209 : vector<8x64xf32>
    %cst_88 = arith.constant dense<0.000000e+00> : vector<8x32xf32>
    %211 = tpu.matmul %210, %61, %cst_88 {dimension_numbers = #tpu.dot_dimension_numbers<[1], [0], [0], [1], [0, 0, 1, 1], [], []>} : vector<8x64xf32>, vector<64x32xf32>, vector<8x32xf32> -> vector<8x32xf32>
    %212 = arith.addf %167, %211 : vector<8x32xf32>
    %213 = vector.broadcast %62 : vector<1x32xf32> to vector<8x32xf32>
    %214 = arith.addf %212, %213 : vector<8x32xf32>
    %cst_89 = arith.constant dense<0.000000e+00> : vector<8xf32>
    %215 = vector.multi_reduction <add>, %214, %cst_89 [1] : vector<8x32xf32> to vector<8xf32>
    %216 = vector.shape_cast %215 : vector<8xf32> to vector<8x1xf32>
    %cst_90 = arith.constant 3.200000e+01 : f32
    %217 = vector.broadcast %cst_90 : f32 to vector<8x1xf32>
    %218 = arith.divf %216, %217 : vector<8x1xf32>
    %219 = vector.broadcast %218 : vector<8x1xf32> to vector<8x32xf32>
    %220 = arith.subf %214, %219 : vector<8x32xf32>
    %221 = arith.mulf %220, %220 : vector<8x32xf32>
    %cst_91 = arith.constant dense<0.000000e+00> : vector<8xf32>
    %222 = vector.multi_reduction <add>, %221, %cst_91 [1] : vector<8x32xf32> to vector<8xf32>
    %223 = vector.shape_cast %222 : vector<8xf32> to vector<8x1xf32>
    %cst_92 = arith.constant 3.200000e+01 : f32
    %224 = vector.broadcast %cst_92 : f32 to vector<8x1xf32>
    %225 = arith.divf %223, %224 : vector<8x1xf32>
    %cst_93 = arith.constant 9.99999996E-13 : f32
    %226 = vector.broadcast %cst_93 : f32 to vector<8x1xf32>
    %227 = arith.addf %225, %226 : vector<8x1xf32>
    %228 = math.rsqrt %227 : vector<8x1xf32>
    %229 = vector.broadcast %228 : vector<8x1xf32> to vector<8x32xf32>
    %230 = arith.mulf %220, %229 : vector<8x32xf32>
    %231 = vector.broadcast %63 : vector<1x32xf32> to vector<8x32xf32>
    %232 = arith.mulf %230, %231 : vector<8x32xf32>
    %233 = vector.broadcast %64 : vector<1x32xf32> to vector<8x32xf32>
    %234 = arith.addf %232, %233 : vector<8x32xf32>
    %c1_i32 = arith.constant 1 : i32
    %cst_94 = arith.constant dense<0.000000e+00> : vector<8x96xf32>
    %235 = tpu.matmul %234, %53, %cst_94 {dimension_numbers = #tpu.dot_dimension_numbers<[1], [0], [0], [1], [0, 0, 1, 1], [], []>} : vector<8x32xf32>, vector<32x96xf32>, vector<8x96xf32> -> vector<8x96xf32>
    %236 = vector.broadcast %54 : vector<1x96xf32> to vector<8x96xf32>
    %237 = arith.addf %235, %236 : vector<8x96xf32>
    %238 = vector.extract_strided_slice %237 {offsets = [0, 0], sizes = [8, 32], strides = [1, 1]} : vector<8x96xf32> to vector<8x32xf32>
    %239 = vector.shape_cast %238 : vector<8x32xf32> to vector<1x8x32xf32>
    %240 = vector.extract_strided_slice %237 {offsets = [0, 32], sizes = [8, 32], strides = [1, 1]} : vector<8x96xf32> to vector<8x32xf32>
    %241 = vector.shape_cast %240 : vector<8x32xf32> to vector<1x8x32xf32>
    %242 = vector.extract_strided_slice %237 {offsets = [0, 64], sizes = [8, 32], strides = [1, 1]} : vector<8x96xf32> to vector<8x32xf32>
    %243 = vector.shape_cast %242 : vector<8x32xf32> to vector<1x8x32xf32>
    %244 = vector.extract_strided_slice %239 {offsets = [0, 0, 0], sizes = [1, 8, 8], strides = [1, 1, 1]} : vector<1x8x32xf32> to vector<1x8x8xf32>
    %245 = vector.extract_strided_slice %241 {offsets = [0, 0, 0], sizes = [1, 8, 8], strides = [1, 1, 1]} : vector<1x8x32xf32> to vector<1x8x8xf32>
    %246 = vector.extract_strided_slice %243 {offsets = [0, 0, 0], sizes = [1, 8, 8], strides = [1, 1, 1]} : vector<1x8x32xf32> to vector<1x8x8xf32>
    "tpu.trace_start"() <{level = 10 : i32, message = "bqd,bkd->bqk"}> : () -> ()
    %cst_95 = arith.constant dense<0.000000e+00> : vector<1x8x8xf32>
    %247 = tpu.matmul %244, %245, %cst_95 {dimension_numbers = #tpu.dot_dimension_numbers<[2], [2], [1], [1], [0, 0, 0, 1, 1, 1], [0], [0]>} : vector<1x8x8xf32>, vector<1x8x8xf32>, vector<1x8x8xf32> -> vector<1x8x8xf32>
    "tpu.trace_stop"() : () -> ()
    %cst_96 = arith.constant 0.353553385 : f32
    %248 = vector.broadcast %cst_96 : f32 to vector<1x8x8xf32>
    %249 = arith.mulf %247, %248 : vector<1x8x8xf32>
    %cst_97 = arith.constant dense<0xFF800000> : vector<1x8xf32>
    %250 = vector.multi_reduction <maximumf>, %249, %cst_97 [2] : vector<1x8x8xf32> to vector<1x8xf32>
    %251 = vector.shape_cast %250 : vector<1x8xf32> to vector<1x8x1xf32>
    %252 = vector.broadcast %251 : vector<1x8x1xf32> to vector<1x8x8xf32>
    %253 = arith.subf %249, %252 : vector<1x8x8xf32>
    %254 = math.exp %253 : vector<1x8x8xf32>
    %cst_98 = arith.constant dense<0.000000e+00> : vector<1x8xf32>
    %255 = vector.multi_reduction <add>, %254, %cst_98 [2] : vector<1x8x8xf32> to vector<1x8xf32>
    %256 = vector.shape_cast %255 : vector<1x8xf32> to vector<1x8x1xf32>
    %257 = tpu.reciprocal %256 : vector<1x8x1xf32> -> vector<1x8x1xf32>
    %258 = vector.broadcast %257 : vector<1x8x1xf32> to vector<1x8x8xf32>
    %259 = arith.mulf %254, %258 : vector<1x8x8xf32>
    "tpu.trace_start"() <{level = 10 : i32, message = "bqk,bkd->bqd"}> : () -> ()
    %cst_99 = arith.constant dense<0.000000e+00> : vector<1x8x8xf32>
    %260 = tpu.matmul %259, %246, %cst_99 {dimension_numbers = #tpu.dot_dimension_numbers<[2], [1], [1], [2], [0, 0, 0, 1, 1, 2], [0], [0]>} : vector<1x8x8xf32>, vector<1x8x8xf32>, vector<1x8x8xf32> -> vector<1x8x8xf32>
    "tpu.trace_stop"() : () -> ()
    %261 = vector.extract_strided_slice %239 {offsets = [0, 0, 8], sizes = [1, 8, 8], strides = [1, 1, 1]} : vector<1x8x32xf32> to vector<1x8x8xf32>
    %262 = vector.extract_strided_slice %241 {offsets = [0, 0, 8], sizes = [1, 8, 8], strides = [1, 1, 1]} : vector<1x8x32xf32> to vector<1x8x8xf32>
    %263 = vector.extract_strided_slice %243 {offsets = [0, 0, 8], sizes = [1, 8, 8], strides = [1, 1, 1]} : vector<1x8x32xf32> to vector<1x8x8xf32>
    "tpu.trace_start"() <{level = 10 : i32, message = "bqd,bkd->bqk"}> : () -> ()
    %cst_100 = arith.constant dense<0.000000e+00> : vector<1x8x8xf32>
    %264 = tpu.matmul %261, %262, %cst_100 {dimension_numbers = #tpu.dot_dimension_numbers<[2], [2], [1], [1], [0, 0, 0, 1, 1, 1], [0], [0]>} : vector<1x8x8xf32>, vector<1x8x8xf32>, vector<1x8x8xf32> -> vector<1x8x8xf32>
    "tpu.trace_stop"() : () -> ()
    %cst_101 = arith.constant 0.353553385 : f32
    %265 = vector.broadcast %cst_101 : f32 to vector<1x8x8xf32>
    %266 = arith.mulf %264, %265 : vector<1x8x8xf32>
    %cst_102 = arith.constant dense<0xFF800000> : vector<1x8xf32>
    %267 = vector.multi_reduction <maximumf>, %266, %cst_102 [2] : vector<1x8x8xf32> to vector<1x8xf32>
    %268 = vector.shape_cast %267 : vector<1x8xf32> to vector<1x8x1xf32>
    %269 = vector.broadcast %268 : vector<1x8x1xf32> to vector<1x8x8xf32>
    %270 = arith.subf %266, %269 : vector<1x8x8xf32>
    %271 = math.exp %270 : vector<1x8x8xf32>
    %cst_103 = arith.constant dense<0.000000e+00> : vector<1x8xf32>
    %272 = vector.multi_reduction <add>, %271, %cst_103 [2] : vector<1x8x8xf32> to vector<1x8xf32>
    %273 = vector.shape_cast %272 : vector<1x8xf32> to vector<1x8x1xf32>
    %274 = tpu.reciprocal %273 : vector<1x8x1xf32> -> vector<1x8x1xf32>
    %275 = vector.broadcast %274 : vector<1x8x1xf32> to vector<1x8x8xf32>
    %276 = arith.mulf %271, %275 : vector<1x8x8xf32>
    "tpu.trace_start"() <{level = 10 : i32, message = "bqk,bkd->bqd"}> : () -> ()
    %cst_104 = arith.constant dense<0.000000e+00> : vector<1x8x8xf32>
    %277 = tpu.matmul %276, %263, %cst_104 {dimension_numbers = #tpu.dot_dimension_numbers<[2], [1], [1], [2], [0, 0, 0, 1, 1, 2], [0], [0]>} : vector<1x8x8xf32>, vector<1x8x8xf32>, vector<1x8x8xf32> -> vector<1x8x8xf32>
    "tpu.trace_stop"() : () -> ()
    %278 = vector.extract_strided_slice %239 {offsets = [0, 0, 16], sizes = [1, 8, 8], strides = [1, 1, 1]} : vector<1x8x32xf32> to vector<1x8x8xf32>
    %279 = vector.extract_strided_slice %241 {offsets = [0, 0, 16], sizes = [1, 8, 8], strides = [1, 1, 1]} : vector<1x8x32xf32> to vector<1x8x8xf32>
    %280 = vector.extract_strided_slice %243 {offsets = [0, 0, 16], sizes = [1, 8, 8], strides = [1, 1, 1]} : vector<1x8x32xf32> to vector<1x8x8xf32>
    "tpu.trace_start"() <{level = 10 : i32, message = "bqd,bkd->bqk"}> : () -> ()
    %cst_105 = arith.constant dense<0.000000e+00> : vector<1x8x8xf32>
    %281 = tpu.matmul %278, %279, %cst_105 {dimension_numbers = #tpu.dot_dimension_numbers<[2], [2], [1], [1], [0, 0, 0, 1, 1, 1], [0], [0]>} : vector<1x8x8xf32>, vector<1x8x8xf32>, vector<1x8x8xf32> -> vector<1x8x8xf32>
    "tpu.trace_stop"() : () -> ()
    %cst_106 = arith.constant 0.353553385 : f32
    %282 = vector.broadcast %cst_106 : f32 to vector<1x8x8xf32>
    %283 = arith.mulf %281, %282 : vector<1x8x8xf32>
    %cst_107 = arith.constant dense<0xFF800000> : vector<1x8xf32>
    %284 = vector.multi_reduction <maximumf>, %283, %cst_107 [2] : vector<1x8x8xf32> to vector<1x8xf32>
    %285 = vector.shape_cast %284 : vector<1x8xf32> to vector<1x8x1xf32>
    %286 = vector.broadcast %285 : vector<1x8x1xf32> to vector<1x8x8xf32>
    %287 = arith.subf %283, %286 : vector<1x8x8xf32>
    %288 = math.exp %287 : vector<1x8x8xf32>
    %cst_108 = arith.constant dense<0.000000e+00> : vector<1x8xf32>
    %289 = vector.multi_reduction <add>, %288, %cst_108 [2] : vector<1x8x8xf32> to vector<1x8xf32>
    %290 = vector.shape_cast %289 : vector<1x8xf32> to vector<1x8x1xf32>
    %291 = tpu.reciprocal %290 : vector<1x8x1xf32> -> vector<1x8x1xf32>
    %292 = vector.broadcast %291 : vector<1x8x1xf32> to vector<1x8x8xf32>
    %293 = arith.mulf %288, %292 : vector<1x8x8xf32>
    "tpu.trace_start"() <{level = 10 : i32, message = "bqk,bkd->bqd"}> : () -> ()
    %cst_109 = arith.constant dense<0.000000e+00> : vector<1x8x8xf32>
    %294 = tpu.matmul %293, %280, %cst_109 {dimension_numbers = #tpu.dot_dimension_numbers<[2], [1], [1], [2], [0, 0, 0, 1, 1, 2], [0], [0]>} : vector<1x8x8xf32>, vector<1x8x8xf32>, vector<1x8x8xf32> -> vector<1x8x8xf32>
    "tpu.trace_stop"() : () -> ()
    %295 = vector.extract_strided_slice %239 {offsets = [0, 0, 24], sizes = [1, 8, 8], strides = [1, 1, 1]} : vector<1x8x32xf32> to vector<1x8x8xf32>
    %296 = vector.extract_strided_slice %241 {offsets = [0, 0, 24], sizes = [1, 8, 8], strides = [1, 1, 1]} : vector<1x8x32xf32> to vector<1x8x8xf32>
    %297 = vector.extract_strided_slice %243 {offsets = [0, 0, 24], sizes = [1, 8, 8], strides = [1, 1, 1]} : vector<1x8x32xf32> to vector<1x8x8xf32>
    "tpu.trace_start"() <{level = 10 : i32, message = "bqd,bkd->bqk"}> : () -> ()
    %cst_110 = arith.constant dense<0.000000e+00> : vector<1x8x8xf32>
    %298 = tpu.matmul %295, %296, %cst_110 {dimension_numbers = #tpu.dot_dimension_numbers<[2], [2], [1], [1], [0, 0, 0, 1, 1, 1], [0], [0]>} : vector<1x8x8xf32>, vector<1x8x8xf32>, vector<1x8x8xf32> -> vector<1x8x8xf32>
    "tpu.trace_stop"() : () -> ()
    %cst_111 = arith.constant 0.353553385 : f32
    %299 = vector.broadcast %cst_111 : f32 to vector<1x8x8xf32>
    %300 = arith.mulf %298, %299 : vector<1x8x8xf32>
    %cst_112 = arith.constant dense<0xFF800000> : vector<1x8xf32>
    %301 = vector.multi_reduction <maximumf>, %300, %cst_112 [2] : vector<1x8x8xf32> to vector<1x8xf32>
    %302 = vector.shape_cast %301 : vector<1x8xf32> to vector<1x8x1xf32>
    %303 = vector.broadcast %302 : vector<1x8x1xf32> to vector<1x8x8xf32>
    %304 = arith.subf %300, %303 : vector<1x8x8xf32>
    %305 = math.exp %304 : vector<1x8x8xf32>
    %cst_113 = arith.constant dense<0.000000e+00> : vector<1x8xf32>
    %306 = vector.multi_reduction <add>, %305, %cst_113 [2] : vector<1x8x8xf32> to vector<1x8xf32>
    %307 = vector.shape_cast %306 : vector<1x8xf32> to vector<1x8x1xf32>
    %308 = tpu.reciprocal %307 : vector<1x8x1xf32> -> vector<1x8x1xf32>
    %309 = vector.broadcast %308 : vector<1x8x1xf32> to vector<1x8x8xf32>
    %310 = arith.mulf %305, %309 : vector<1x8x8xf32>
    "tpu.trace_start"() <{level = 10 : i32, message = "bqk,bkd->bqd"}> : () -> ()
    %cst_114 = arith.constant dense<0.000000e+00> : vector<1x8x8xf32>
    %311 = tpu.matmul %310, %297, %cst_114 {dimension_numbers = #tpu.dot_dimension_numbers<[2], [1], [1], [2], [0, 0, 0, 1, 1, 2], [0], [0]>} : vector<1x8x8xf32>, vector<1x8x8xf32>, vector<1x8x8xf32> -> vector<1x8x8xf32>
    "tpu.trace_stop"() : () -> ()
    %312 = tpu.concatenate %260, %277, %294, %311 in 2 : vector<1x8x8xf32>, vector<1x8x8xf32>, vector<1x8x8xf32>, vector<1x8x8xf32> -> vector<1x8x32xf32>
    %313 = vector.shape_cast %312 : vector<1x8x32xf32> to vector<8x32xf32>
    %cst_115 = arith.constant dense<0.000000e+00> : vector<8x32xf32>
    %314 = tpu.matmul %313, %55, %cst_115 {dimension_numbers = #tpu.dot_dimension_numbers<[1], [0], [0], [1], [0, 0, 1, 1], [], []>} : vector<8x32xf32>, vector<32x32xf32>, vector<8x32xf32> -> vector<8x32xf32>
    %315 = arith.addf %313, %314 : vector<8x32xf32>
    %316 = vector.broadcast %56 : vector<1x32xf32> to vector<8x32xf32>
    %317 = arith.addf %315, %316 : vector<8x32xf32>
    %cst_116 = arith.constant dense<0.000000e+00> : vector<8xf32>
    %318 = vector.multi_reduction <add>, %317, %cst_116 [1] : vector<8x32xf32> to vector<8xf32>
    %319 = vector.shape_cast %318 : vector<8xf32> to vector<8x1xf32>
    %cst_117 = arith.constant 3.200000e+01 : f32
    %320 = vector.broadcast %cst_117 : f32 to vector<8x1xf32>
    %321 = arith.divf %319, %320 : vector<8x1xf32>
    %322 = vector.broadcast %321 : vector<8x1xf32> to vector<8x32xf32>
    %323 = arith.subf %317, %322 : vector<8x32xf32>
    %324 = arith.mulf %323, %323 : vector<8x32xf32>
    %cst_118 = arith.constant dense<0.000000e+00> : vector<8xf32>
    %325 = vector.multi_reduction <add>, %324, %cst_118 [1] : vector<8x32xf32> to vector<8xf32>
    %326 = vector.shape_cast %325 : vector<8xf32> to vector<8x1xf32>
    %cst_119 = arith.constant 3.200000e+01 : f32
    %327 = vector.broadcast %cst_119 : f32 to vector<8x1xf32>
    %328 = arith.divf %326, %327 : vector<8x1xf32>
    %cst_120 = arith.constant 9.99999996E-13 : f32
    %329 = vector.broadcast %cst_120 : f32 to vector<8x1xf32>
    %330 = arith.addf %328, %329 : vector<8x1xf32>
    %331 = math.rsqrt %330 : vector<8x1xf32>
    %332 = vector.broadcast %331 : vector<8x1xf32> to vector<8x32xf32>
    %333 = arith.mulf %323, %332 : vector<8x32xf32>
    %334 = vector.broadcast %57 : vector<1x32xf32> to vector<8x32xf32>
    %335 = arith.mulf %333, %334 : vector<8x32xf32>
    %336 = vector.broadcast %58 : vector<1x32xf32> to vector<8x32xf32>
    %337 = arith.addf %335, %336 : vector<8x32xf32>
    %cst_121 = arith.constant dense<0.000000e+00> : vector<8x64xf32>
    %338 = tpu.matmul %337, %59, %cst_121 {dimension_numbers = #tpu.dot_dimension_numbers<[1], [0], [0], [1], [0, 0, 1, 1], [], []>} : vector<8x32xf32>, vector<32x64xf32>, vector<8x64xf32> -> vector<8x64xf32>
    %339 = vector.broadcast %60 : vector<1x64xf32> to vector<8x64xf32>
    %340 = arith.addf %338, %339 : vector<8x64xf32>
    %cst_122 = arith.constant 5.000000e-01 : f32
    %341 = vector.broadcast %cst_122 : f32 to vector<8x64xf32>
    %342 = arith.mulf %340, %341 : vector<8x64xf32>
    %cst_123 = arith.constant 0.707106769 : f32
    %343 = vector.broadcast %cst_123 : f32 to vector<8x64xf32>
    %344 = arith.mulf %340, %343 : vector<8x64xf32>
    %345 = math.absf %344 : vector<8x64xf32>
    %cst_124 = arith.constant 0.327591091 : f32
    %346 = vector.broadcast %cst_124 : f32 to vector<8x64xf32>
    %347 = arith.mulf %346, %345 : vector<8x64xf32>
    %cst_125 = arith.constant 1.000000e+00 : f32
    %348 = vector.broadcast %cst_125 : f32 to vector<8x64xf32>
    %349 = arith.addf %348, %347 : vector<8x64xf32>
    %cst_126 = arith.constant 1.000000e+00 : f32
    %350 = vector.broadcast %cst_126 : f32 to vector<8x64xf32>
    %351 = arith.divf %350, %349 : vector<8x64xf32>
    %cst_127 = arith.constant 1.06140542 : f32
    %352 = vector.broadcast %cst_127 : f32 to vector<8x64xf32>
    %353 = arith.mulf %351, %352 : vector<8x64xf32>
    %cst_128 = arith.constant -1.45315206 : f32
    %354 = vector.broadcast %cst_128 : f32 to vector<8x64xf32>
    %355 = arith.addf %354, %353 : vector<8x64xf32>
    %356 = arith.mulf %351, %355 : vector<8x64xf32>
    %cst_129 = arith.constant 1.42141378 : f32
    %357 = vector.broadcast %cst_129 : f32 to vector<8x64xf32>
    %358 = arith.addf %357, %356 : vector<8x64xf32>
    %359 = arith.mulf %351, %358 : vector<8x64xf32>
    %cst_130 = arith.constant -0.284496725 : f32
    %360 = vector.broadcast %cst_130 : f32 to vector<8x64xf32>
    %361 = arith.addf %360, %359 : vector<8x64xf32>
    %362 = arith.mulf %351, %361 : vector<8x64xf32>
    %cst_131 = arith.constant 0.254829586 : f32
    %363 = vector.broadcast %cst_131 : f32 to vector<8x64xf32>
    %364 = arith.addf %363, %362 : vector<8x64xf32>
    %365 = arith.mulf %351, %364 : vector<8x64xf32>
    %cst_132 = arith.constant 0.000000e+00 : f32
    %366 = vector.broadcast %cst_132 : f32 to vector<8x64xf32>
    %367 = arith.subf %366, %345 : vector<8x64xf32>
    %368 = arith.mulf %367, %345 : vector<8x64xf32>
    %369 = math.exp %368 : vector<8x64xf32>
    %370 = arith.mulf %365, %369 : vector<8x64xf32>
    %cst_133 = arith.constant 1.000000e+00 : f32
    %371 = vector.broadcast %cst_133 : f32 to vector<8x64xf32>
    %372 = arith.subf %371, %370 : vector<8x64xf32>
    %cst_134 = arith.constant 0.000000e+00 : f32
    %373 = vector.broadcast %cst_134 : f32 to vector<8x64xf32>
    %374 = arith.cmpf oge, %344, %373 : vector<8x64xf32>
    %cst_135 = arith.constant 0.000000e+00 : f32
    %375 = vector.broadcast %cst_135 : f32 to vector<8x64xf32>
    %376 = arith.subf %375, %372 : vector<8x64xf32>
    %377 = arith.select %374, %372, %376 : vector<8x64xi1>, vector<8x64xf32>
    %cst_136 = arith.constant 1.000000e+00 : f32
    %378 = vector.broadcast %cst_136 : f32 to vector<8x64xf32>
    %379 = arith.addf %378, %377 : vector<8x64xf32>
    %380 = arith.mulf %342, %379 : vector<8x64xf32>
    %cst_137 = arith.constant dense<0.000000e+00> : vector<8x32xf32>
    %381 = tpu.matmul %380, %61, %cst_137 {dimension_numbers = #tpu.dot_dimension_numbers<[1], [0], [0], [1], [0, 0, 1, 1], [], []>} : vector<8x64xf32>, vector<64x32xf32>, vector<8x32xf32> -> vector<8x32xf32>
    %382 = arith.addf %337, %381 : vector<8x32xf32>
    %383 = vector.broadcast %62 : vector<1x32xf32> to vector<8x32xf32>
    %384 = arith.addf %382, %383 : vector<8x32xf32>
    %cst_138 = arith.constant dense<0.000000e+00> : vector<8xf32>
    %385 = vector.multi_reduction <add>, %384, %cst_138 [1] : vector<8x32xf32> to vector<8xf32>
    %386 = vector.shape_cast %385 : vector<8xf32> to vector<8x1xf32>
    %cst_139 = arith.constant 3.200000e+01 : f32
    %387 = vector.broadcast %cst_139 : f32 to vector<8x1xf32>
    %388 = arith.divf %386, %387 : vector<8x1xf32>
    %389 = vector.broadcast %388 : vector<8x1xf32> to vector<8x32xf32>
    %390 = arith.subf %384, %389 : vector<8x32xf32>
    %391 = arith.mulf %390, %390 : vector<8x32xf32>
    %cst_140 = arith.constant dense<0.000000e+00> : vector<8xf32>
    %392 = vector.multi_reduction <add>, %391, %cst_140 [1] : vector<8x32xf32> to vector<8xf32>
    %393 = vector.shape_cast %392 : vector<8xf32> to vector<8x1xf32>
    %cst_141 = arith.constant 3.200000e+01 : f32
    %394 = vector.broadcast %cst_141 : f32 to vector<8x1xf32>
    %395 = arith.divf %393, %394 : vector<8x1xf32>
    %cst_142 = arith.constant 9.99999996E-13 : f32
    %396 = vector.broadcast %cst_142 : f32 to vector<8x1xf32>
    %397 = arith.addf %395, %396 : vector<8x1xf32>
    %398 = math.rsqrt %397 : vector<8x1xf32>
    %399 = vector.broadcast %398 : vector<8x1xf32> to vector<8x32xf32>
    %400 = arith.mulf %390, %399 : vector<8x32xf32>
    %401 = vector.broadcast %63 : vector<1x32xf32> to vector<8x32xf32>
    %402 = arith.mulf %400, %401 : vector<8x32xf32>
    %403 = vector.broadcast %64 : vector<1x32xf32> to vector<8x32xf32>
    %404 = arith.addf %402, %403 : vector<8x32xf32>
    %c0_143 = arith.constant 0 : index
    %c0_144 = arith.constant 0 : index
    %405 = vector.load %arg19[%c0_143, %c0_144] : memref<8x32xf32, #tpu.memory_space<vmem>>, vector<8x32xf32>
    tpu.vector_store %arg19[%c0_143, %c0_144], %404 {strides = array<i32>} : memref<8x32xf32, #tpu.memory_space<vmem>>, vector<8x32xf32>,
    return
  }
  func.func @transform_0(%arg0: i32) -> (i32, i32) {
    %c0_i32 = arith.constant 0 : i32
    %c0_i32_0 = arith.constant 0 : i32
    return %arg0, %c0_i32 : i32, i32
  }
  func.func @transform_1(%arg0: i32) -> (i32, i32) {
    %c0_i32 = arith.constant 0 : i32
    %c0_i32_0 = arith.constant 0 : i32
    %c0_i32_1 = arith.constant 0 : i32
    return %c0_i32, %c0_i32_0 : i32, i32
  }
  func.func @transform_2(%arg0: i32) -> (i32, i32) {
    %c0_i32 = arith.constant 0 : i32
    %c0_i32_0 = arith.constant 0 : i32
    %c0_i32_1 = arith.constant 0 : i32
    return %c0_i32, %c0_i32_0 : i32, i32
  }
  func.func @transform_3(%arg0: i32) -> (i32, i32) {
    %c0_i32 = arith.constant 0 : i32
    %c0_i32_0 = arith.constant 0 : i32
    %c0_i32_1 = arith.constant 0 : i32
    return %c0_i32, %c0_i32_0 : i32, i32
  }
  func.func @transform_4(%arg0: i32) -> (i32, i32) {
    %c0_i32 = arith.constant 0 : i32
    %c0_i32_0 = arith.constant 0 : i32
    %c0_i32_1 = arith.constant 0 : i32
    return %c0_i32, %c0_i32_0 : i32, i32
  }
  func.func @transform_5(%arg0: i32) -> (i32, i32) {
    %c0_i32 = arith.constant 0 : i32
    %c0_i32_0 = arith.constant 0 : i32
    %c0_i32_1 = arith.constant 0 : i32
    return %c0_i32, %c0_i32_0 : i32, i32
  }
  func.func @transform_6(%arg0: i32) -> (i32, i32) {
    %c0_i32 = arith.constant 0 : i32
    %c0_i32_0 = arith.constant 0 : i32
    %c0_i32_1 = arith.constant 0 : i32
    return %c0_i32, %c0_i32_0 : i32, i32
  }
  func.func @transform_7(%arg0: i32) -> (i32, i32) {
    %c0_i32 = arith.constant 0 : i32
    %c0_i32_0 = arith.constant 0 : i32
    %c0_i32_1 = arith.constant 0 : i32
    return %c0_i32, %c0_i32_0 : i32, i32
  }
  func.func @transform_8(%arg0: i32) -> (i32, i32) {
    %c0_i32 = arith.constant 0 : i32
    %c0_i32_0 = arith.constant 0 : i32
    %c0_i32_1 = arith.constant 0 : i32
    return %c0_i32, %c0_i32_0 : i32, i32
  }
  func.func @transform_9(%arg0: i32) -> (i32, i32) {
    %c0_i32 = arith.constant 0 : i32
    %c0_i32_0 = arith.constant 0 : i32
    %c0_i32_1 = arith.constant 0 : i32
    return %c0_i32, %c0_i32_0 : i32, i32
  }
  func.func @transform_10(%arg0: i32) -> (i32, i32) {
    %c0_i32 = arith.constant 0 : i32
    %c0_i32_0 = arith.constant 0 : i32
    %c0_i32_1 = arith.constant 0 : i32
    return %c0_i32, %c0_i32_0 : i32, i32
  }
  func.func @transform_11(%arg0: i32) -> (i32, i32) {
    %c0_i32 = arith.constant 0 : i32
    %c0_i32_0 = arith.constant 0 : i32
    %c0_i32_1 = arith.constant 0 : i32
    return %c0_i32, %c0_i32_0 : i32, i32
  }
  func.func @transform_12(%arg0: i32) -> (i32, i32) {
    %c0_i32 = arith.constant 0 : i32
    %c0_i32_0 = arith.constant 0 : i32
    %c0_i32_1 = arith.constant 0 : i32
    return %c0_i32, %c0_i32_0 : i32, i32
  }
  func.func @transform_13(%arg0: i32) -> (i32, i32) {
    %c0_i32 = arith.constant 0 : i32
    %c0_i32_0 = arith.constant 0 : i32
    %c0_i32_1 = arith.constant 0 : i32
    return %c0_i32, %c0_i32_0 : i32, i32
  }
  func.func @transform_14(%arg0: i32) -> (i32, i32) {
    %c0_i32 = arith.constant 0 : i32
    %c0_i32_0 = arith.constant 0 : i32
    %c0_i32_1 = arith.constant 0 : i32
    return %c0_i32, %c0_i32_0 : i32, i32
  }
  func.func @transform_15(%arg0: i32) -> (i32, i32) {
    %c0_i32 = arith.constant 0 : i32
    %c0_i32_0 = arith.constant 0 : i32
    %c0_i32_1 = arith.constant 0 : i32
    return %c0_i32, %c0_i32_0 : i32, i32
  }
  func.func @transform_16(%arg0: i32) -> (i32, i32) {
    %c0_i32 = arith.constant 0 : i32
    %c0_i32_0 = arith.constant 0 : i32
    %c0_i32_1 = arith.constant 0 : i32
    return %c0_i32, %c0_i32_0 : i32, i32
  }
  func.func @transform_17(%arg0: i32) -> (i32, i32) {
    %c0_i32 = arith.constant 0 : i32
    %c0_i32_0 = arith.constant 0 : i32
    %c0_i32_1 = arith.constant 0 : i32
    return %c0_i32, %c0_i32_0 : i32, i32
  }
  func.func @transform_18(%arg0: i32) -> (i32, i32) {
    %c0_i32 = arith.constant 0 : i32
    %c0_i32_0 = arith.constant 0 : i32
    return %arg0, %c0_i32 : i32, i32
  }
}

</mosaic_0001>

<bundles_post_ra>
// kernel: _lambda_.1
= control target key start
LH: loop header
LB: loop body
LE: loop exit
PB: predicated region body
PF: predicated region fallthrough
CT: control target
= control target key end

     0   :  { %s4913_s0 = inlined_call_operand.hbm [shape: f32[16,12], index: 0, kind: input, shape index: {}]   ;;  %s4914_s1 = inlined_call_operand.vmem [shape: f32[12,32], index: 1, kind: input, shape index: {}]   ;;  %s4915_s2 = inlined_call_operand.hbm [shape: f32[1,32], index: 2, kind: input, shape index: {}]   ;;  %s4916_s3 = inlined_call_operand.vmem [shape: f32[8,32], index: 3, kind: input, shape index: {}]   ;;  %s4917_s4 = inlined_call_operand.vmem [shape: f32[1,32], index: 4, kind: input, shape index: {}, may-alias: {4,10,16}]   ;;  %s4918_s5 = inlined_call_operand.vmem [shape: f32[1,32], index: 5, kind: input, shape index: {}, may-alias: {5,11,17}]   ;;  %s4919_s6 = inlined_call_operand.hbm [shape: f32[32,96], index: 6, kind: input, shape index: {}]   ;;  %s4920_s7 = inlined_call_operand.hbm [shape: f32[1,96], index: 7, kind: input, shape index: {}]   ;;  %s4921_s8 = inlined_call_operand.hbm [shape: f32[32,32], index: 8, kind: input, shape index: {}]   ;;  %s4922_s9 = inlined_call_operand.hbm [shape: f32[1,32], index: 9, kind: input, shape index: {}]   ;;  %s4923_s10 = inlined_call_operand.vmem [shape: f32[1,32], index: 10, kind: input, shape index: {}, may-alias: {4,10,16}]   ;;  %s4924_s11 = inlined_call_operand.vmem [shape: f32[1,32], index: 11, kind: input, shape index: {}, may-alias: {5,11,17}]   ;;  %s4925_s12 = inlined_call_operand.vmem [shape: f32[32,64], index: 12, kind: input, shape index: {}]   ;;  %s4926_s13 = inlined_call_operand.hbm [shape: f32[1,64], index: 13, kind: input, shape index: {}]   ;;  %s4927_s14 = inlined_call_operand.hbm [shape: f32[64,32], index: 14, kind: input, shape index: {}]   ;;  %s4928_s15 = inlined_call_operand.hbm [shape: f32[1,32], index: 15, kind: input, shape index: {}]   ;;  %s4929_s16 = inlined_call_operand.vmem [shape: f32[1,32], index: 16, kind: input, shape index: {}, may-alias: {4,10,16}]   ;;  %s4930_s17 = inlined_call_operand.vmem [shape: f32[1,32], index: 17, kind: input, shape index: {}, may-alias: {5,11,17}]   ;;  %s4931_s18 = inlined_call_operand.hbm [shape: f32[16,32], index: 18, kind: output, shape index: {}]  }
   0x1   :  { %4953 = sst [smem:[#allocation24_spill]] %s4913_s0 }
   0x2   :  { %4954 = sst [smem:[#allocation25_spill]] %s4914_s1 }
   0x3   :  { %4955 = sst [smem:[#allocation26_spill]] %s4915_s2 }
   0x4   :  { %4956 = sst [smem:[#allocation27_spill]] %s4919_s6 }
   0x5   :  { %4957 = sst [smem:[#allocation28_spill]] %s4920_s7 }
   0x6   :  { %4958 = sst [smem:[#allocation29_spill]] %s4922_s9 }
   0x7   :  { %4959 = sst [smem:[#allocation30_spill]] %s4923_s10 }
   0x8   :  { %4960 = sst [smem:[#allocation31_spill]] %s4924_s11 }
   0x9   :  { %4961 = sst [smem:[#allocation32_spill]] %s4925_s12 }
   0xa   :  { %4962 = sst [smem:[#allocation33_spill]] %s4929_s16 }
   0xb   :  { %4963 = sst [smem:[#allocation34_spill]] %s4930_s17 }
   0xc   :  { %4964 = sst [smem:[#allocation35_spill]] %s4931_s18 }
   0xd   :  { %23 = vsyncpa [#allocation3], 0 }
   0xe   :  { %25 = vsyncpa [#allocation3 + $0x1], 0 }
   0xf   :  { %26 = vsyncpa [#allocation6], 0 }
  0x10   :  { %27 = vsyncpa [#allocation9], 0 }
  0x11   :  { %28 = vsyncpa [#allocation12], 0 }
  0x12   :  { %29 = vsyncpa [#allocation15], 0 }
  0x13   :  { %30 = vsyncpa [#allocation4], 0 }
  0x14   :  { %32 = vsyncpa [#allocation4 + $0x1], 0  ;;  %s4209_s27 = smov 0   ;;  %s4211_s28 = smov 0  }
  0x15   :  { %s4213_s29 = smov 0   ;;  %s4215_s30 = smov 0  }
  0x16 LB: > { %s4084_s0 = smov [#allocation5]   ;;  %s4230_s1 = sadd.s32 4294967295, %s4082_s30   ;;  %s4082_s30 = sphi %s4215_s30, %s5013_s30   ;;  %s4078_s29 = sphi %s4213_s29, %s5012_s29   ;;  %s4074_s28 = sphi %s4211_s28, %s5011_s28   ;;  %s4070_s27 = sphi %s4209_s27, %s5010_s27  }
  0x17   : > { %s468_s19 = sshll.u32 %s4084_s0, 4  ;;  %p3137_p0 = scmp.ge.s32.totalorder %s4082_s30, 1  ;;  %s4235_s19 = int_to_ptr.vmem [resolvable:$true] %s468_s19 }
  0x18   : > { %p4938_p1 = scmp.eq.s32.totalorder %s4230_s1, 0  ;;  %p452_p2 = scmp.lt.s32.totalorder %s4082_s30, 3 }
  0x19   : > { %s4085_s21 = smov [#allocation8]   ;;  %s4086_s2 = smov [#allocation11]  }
  0x1a   : > { %p4237_p3 = pnand %p3137_p0, %p452_p2  ;;  %s501_s22 = sshll.u32 %s4085_s21, 4  ;;  %s4244_s22 = int_to_ptr.vmem [resolvable:$true] %s501_s22 }
  0x1b   : > { %s525_s23 = sshll.u32 %s4086_s2, 4  ;;  %s4967_s0 = sld [smem:[#allocation26_spill]]  ;;  %s4252_s23 = int_to_ptr.vmem [resolvable:$true] %s525_s23 }
  0x1c   : > { %s4965_s20 = scalar_select %p4237_p3, 1, 0 }
  0x1d   : > { %p3583_p5 = pneg %p4237_p3 }
  0x1f   : > { %p4248_p6 = pnand %p3583_p5, %p4938_p1 }
  0x21   : > { %s3746_s18 = scalar_lea.hbm %s4967_s0, 16  ;;  %p4262_p8 = pneg %p4248_p6 }
  0x22   : > { %p3747_p7 = scmp.ne.s32.totalorder %s4967_s0, %s3746_s18  ;;  %p3753_p11 = scmp.lt.u32.totalorder %s3746_s18, %s4967_s0 }
  0x24   : > { %p3749_p9 = pnand %p4262_p8, %p3747_p7 }
  0x26   : > { %p3750_p10 = pneg %p3749_p9 }
  0x28   : > { %p3755_p12 = pnand %p3753_p11, %p3750_p10 }
  0x2a   : > { %3758 = shalt.err (!%p3755_p12)
}
  0x2b   : > { %s3759_s16 = scalar_lea.vmem %s4235_s19, 16  ;;  %s3766_s17 = scalar_lea.vmem %s4235_s19, 32 }
  0x2c   : > { %p3760_p13 = scmp.ne.s32.totalorder %s4235_s19, %s3759_s16  ;;  %p3767_p5 = scmp.lt.s32.totalorder %s4235_s19, %s4235_s19 }
  0x2d   : > { %p3768_p7 = scmp.lt.s32.totalorder %s3766_s17, %s3759_s16 }
  0x2e   : > { %p3762_p0 = pnand %p3760_p13, %p4262_p8 }
  0x2f   : > { %p3769_p9 = por %p3768_p7, %p3767_p5 }
  0x30   : > { %p3763_p2 = pneg %p3762_p0 }
  0x32   : > { %p3770_p4 = pnand %p3769_p9, %p3763_p2 }
  0x34   : > { %3773 = shalt.err (!%p3770_p4)
}
  0x35   : > { %3586 = dma.hbm_to_vmem [thread:$0]  (!%p4248_p6), %s4967_s0, 16, %s4235_s19, [#allocation6]  }
  0x36   : > { %s4969_s7 = sld [smem:[#allocation28_spill]] }
  0x3c   : > { %s3774_s2 = scalar_lea.hbm %s4969_s7, 16 }
  0x3d   : > { %p3775_p10 = scmp.ne.s32.totalorder %s4969_s7, %s3774_s2  ;;  %p3781_p4 = scmp.lt.u32.totalorder %s3774_s2, %s4969_s7 }
  0x3f   : > { %p3777_p11 = pnand %p3775_p10, %p4262_p8 }
  0x41   : > { %p3778_p12 = pneg %p3777_p11 }
  0x43   : > { %p3783_p13 = pnand %p3781_p4, %p3778_p12 }
  0x45   : > { %3786 = shalt.err (!%p3783_p13)
}
  0x46   : > { %s3787_s19 = scalar_lea.vmem %s4244_s22, 16  ;;  %s3794_s10 = scalar_lea.vmem %s4244_s22, 32 }
  0x47   : > { %p3788_p0 = scmp.ne.s32.totalorder %s4244_s22, %s3787_s19  ;;  %p3795_p7 = scmp.lt.s32.totalorder %s4244_s22, %s4244_s22 }
  0x48   : > { %p3796_p9 = scmp.lt.s32.totalorder %s3794_s10, %s3787_s19 }
  0x49   : > { %p3790_p2 = pnand %p3788_p0, %p4262_p8 }
  0x4a   : > { %p3797_p10 = por %p3796_p9, %p3795_p7 }
  0x4b   : > { %p3791_p5 = pneg %p3790_p2 }
  0x4d   : > { %p3798_p11 = pnand %p3797_p10, %p3791_p5 }
  0x4f   : > { %3801 = shalt.err (!%p3798_p11)
}
  0x50   : > { %3592 = dma.hbm_to_vmem [thread:$0]  (!%p4248_p6), %s4969_s7, 16, %s4244_s22, [#allocation9]  }
  0x51   : > { %s4970_s9 = sld [smem:[#allocation29_spill]] }
  0x57   : > { %s3802_s26 = scalar_lea.hbm %s4970_s9, 16 }
  0x58   : > { %p3803_p12 = scmp.ne.s32.totalorder %s4970_s9, %s3802_s26  ;;  %p3809_p0 = scmp.lt.u32.totalorder %s3802_s26, %s4970_s9 }
  0x5a   : > { %p3805_p4 = pnand %p3803_p12, %p4262_p8 }
  0x5c   : > { %p3806_p13 = pneg %p3805_p4 }
  0x5e   : > { %p3811_p2 = pnand %p3809_p0, %p3806_p13 }
  0x60   : > { %3814 = shalt.err (!%p3811_p2)
}
  0x61   : > { %s3815_s22 = scalar_lea.vmem %s4252_s23, 16  ;;  %s3822_s10 = scalar_lea.vmem %s4252_s23, 32 }
  0x62   : > { %p3816_p5 = scmp.ne.s32.totalorder %s4252_s23, %s3815_s22  ;;  %p3823_p10 = scmp.lt.s32.totalorder %s4252_s23, %s4252_s23 }
  0x63   : > { %p3824_p11 = scmp.lt.s32.totalorder %s3822_s10, %s3815_s22 }
  0x64   : > { %p3818_p7 = pnand %p3816_p5, %p4262_p8 }
  0x65   : > { %p3825_p12 = por %p3824_p11, %p3823_p10 }
  0x66   : > { %p3819_p9 = pneg %p3818_p7 }
  0x68   : > { %p3826_p4 = pnand %p3825_p12, %p3819_p9 }
  0x6a   : > { %3829 = shalt.err (!%p3826_p4)
}
  0x6b   : > { %3598 = dma.hbm_to_vmem [thread:$0]  (!%p4248_p6), %s4970_s9, 16, %s4252_s23, [#allocation12]  }
  0x6c   : > { %s4087_s18 = smov [#allocation14]   ;;  %s4088_s26 = smov [#allocation7]  }
  0x6d   : > { %s555_s25 = sshll.u32 %s4087_s18, 4  ;;  %s487_s2 = sshll.u32 %s4088_s26, 4  ;;  %s556_s25 = int_to_ptr.vmem [resolvable:$true] %s555_s25  ;;  %s488_s2 = int_to_ptr.vmem [resolvable:$true] %s487_s2 }
  0x6e   : > { %s3830_s19 = scalar_lea.hbm %s4927_s14, 1024 }
  0x6f   : > { %p3831_p13 = scmp.ne.s32.totalorder %s4927_s14, %s3830_s19  ;;  %p3837_p5 = scmp.lt.u32.totalorder %s3830_s19, %s4927_s14 }
  0x71   : > { %p3833_p0 = pnand %p3831_p13, %p4262_p8 }
  0x73   : > { %p3834_p2 = pneg %p3833_p0 }
  0x75   : > { %p3839_p7 = pnand %p3837_p5, %p3834_p2 }
  0x77   : > { %3842 = shalt.err (!%p3839_p7)
}
  0x78   : > { %s3843_s23 = scalar_lea.vmem %s556_s25, 1024  ;;  %p3851_p12 = scmp.lt.s32.totalorder %s556_s25, %s556_s25 }
  0x79   : > { %p3844_p9 = scmp.ne.s32.totalorder %s556_s25, %s3843_s23  ;;  %p3852_p4 = scmp.lt.s32.totalorder %s3843_s23, %s3843_s23 }
  0x7b   : > { %p3846_p10 = pnand %p3844_p9, %p4262_p8  ;;  %p3853_p1 = por %p3852_p4, %p3851_p12 }
  0x7d   : > { %p3847_p11 = pneg %p3846_p10 }
  0x7f   : > { %p3854_p3 = pnand %p3853_p1, %p3847_p11 }
  0x81   : > { %3857 = shalt.err (!%p3854_p3)
}
  0x82   : > { %s4089_s11 = smov 128   ;;  %s4090_s18 = smov 8  }
  0x83   : > { %3604 = dma.hbm_to_vmem [thread:$0]  (!%p4248_p6), %s4927_s14, 1024, %s556_s25, [#allocation15], %s4089_s11, %s4089_s11, %s4090_s18  }
  0x84   : > { %s4971_s6 = sld [smem:[#allocation27_spill]] }
  0x8a   : > { %s3858_s19 = scalar_lea.hbm %s4971_s6, 512 }
  0x8b   : > { %p3859_p1 = scmp.ne.s32.totalorder %s4971_s6, %s3858_s19  ;;  %p3865_p0 = scmp.lt.u32.totalorder %s3858_s19, %s4971_s6 }
  0x8d   : > { %p3861_p3 = pnand %p3859_p1, %p4262_p8 }
  0x8f   : > { %p3862_p13 = pneg %p3861_p3 }
  0x91   : > { %p3867_p2 = pnand %p3865_p0, %p3862_p13 }
  0x93   : > { %3870 = shalt.err (!%p3867_p2)
}
  0x94   : > { %s3871_s0 = scalar_lea.vmem %s488_s2, 512  ;;  %p3879_p10 = scmp.lt.s32.totalorder %s488_s2, %s488_s2 }
  0x95   : > { %p3872_p5 = scmp.ne.s32.totalorder %s488_s2, %s3871_s0  ;;  %p3880_p11 = scmp.lt.s32.totalorder %s3871_s0, %s3871_s0 }
  0x97   : > { %p3874_p7 = pnand %p3872_p5, %p4262_p8  ;;  %p3881_p12 = por %p3880_p11, %p3879_p10 }
  0x99   : > { %p3875_p9 = pneg %p3874_p7 }
  0x9b   : > { %p3882_p4 = pnand %p3881_p12, %p3875_p9 }
  0x9d   : > { %3885 = shalt.err (!%p3882_p4)
}
  0x9e   : > { %3589 = dma.hbm_to_vmem [thread:$0]  (!%p4248_p6), %s4971_s6, 512, %s488_s2, [#allocation6], %s4089_s11, %s4089_s11, %s4090_s18  }
  0x9f   : > { %s4091_s16 = smov [#allocation10]   ;;  %s4092_s19 = smov [#allocation13]  }
  0xa0   : > { %s511_s17 = sshll.u32 %s4091_s16, 4  ;;  %s545_s22 = sshll.u32 %s4092_s19, 4  ;;  %s512_s17 = int_to_ptr.vmem [resolvable:$true] %s511_s17  ;;  %s546_s22 = int_to_ptr.vmem [resolvable:$true] %s545_s22 }
  0xa1   : > { %s3886_s23 = scalar_lea.hbm %s4921_s8, 512 }
  0xa2   : > { %p3887_p1 = scmp.ne.s32.totalorder %s4921_s8, %s3886_s23  ;;  %p3893_p0 = scmp.lt.u32.totalorder %s3886_s23, %s4921_s8 }
  0xa4   : > { %p3889_p3 = pnand %p3887_p1, %p4262_p8 }
  0xa6   : > { %p3890_p13 = pneg %p3889_p3 }
  0xa8   : > { %p3895_p2 = pnand %p3893_p0, %p3890_p13 }
  0xaa   : > { %3898 = shalt.err (!%p3895_p2)
}
  0xab   : > { %s3899_s2 = scalar_lea.vmem %s512_s17, 512  ;;  %p3907_p10 = scmp.lt.s32.totalorder %s512_s17, %s512_s17 }
  0xac   : > { %p3900_p5 = scmp.ne.s32.totalorder %s512_s17, %s3899_s2  ;;  %p3908_p11 = scmp.lt.s32.totalorder %s3899_s2, %s3899_s2 }
  0xae   : > { %p3902_p7 = pnand %p3900_p5, %p4262_p8  ;;  %p3909_p12 = por %p3908_p11, %p3907_p10 }
  0xb0   : > { %p3903_p9 = pneg %p3902_p7 }
  0xb2   : > { %p3910_p4 = pnand %p3909_p12, %p3903_p9 }
  0xb4   : > { %3913 = shalt.err (!%p3910_p4)
}
  0xb5   : > { %3595 = dma.hbm_to_vmem [thread:$0]  (!%p4248_p6), %s4921_s8, 512, %s512_s17, [#allocation9], %s4089_s11, %s4089_s11, %s4090_s18  }
  0xb6   : > { %s3914_s19 = scalar_lea.hbm %s4926_s13, 16 }
  0xb7   : > { %p3915_p1 = scmp.ne.s32.totalorder %s4926_s13, %s3914_s19  ;;  %p3921_p0 = scmp.lt.u32.totalorder %s3914_s19, %s4926_s13 }
  0xb9   : > { %p3917_p3 = pnand %p3915_p1, %p4262_p8 }
  0xbb   : > { %p3918_p13 = pneg %p3917_p3 }
  0xbd   : > { %p3923_p2 = pnand %p3921_p0, %p3918_p13 }
  0xbf   : > { %3926 = shalt.err (!%p3923_p2)
}
  0xc0   : > { %s3927_s25 = scalar_lea.vmem %s546_s22, 16  ;;  %s3934_s11 = scalar_lea.vmem %s546_s22, 32 }
  0xc1   : > { %p3928_p5 = scmp.ne.s32.totalorder %s546_s22, %s3927_s25  ;;  %p3935_p10 = scmp.lt.s32.totalorder %s546_s22, %s546_s22 }
  0xc2   : > { %p3936_p11 = scmp.lt.s32.totalorder %s3934_s11, %s3927_s25 }
  0xc3   : > { %p3930_p7 = pnand %p3928_p5, %p4262_p8 }
  0xc4   : > { %p3937_p12 = por %p3936_p11, %p3935_p10 }
  0xc5   : > { %p3931_p9 = pneg %p3930_p7 }
  0xc7   : > { %p3938_p4 = pnand %p3937_p12, %p3931_p9 }
  0xc9   : > { %3941 = shalt.err (!%p3938_p4)
}
  0xca   : > { %3601 = dma.hbm_to_vmem [thread:$0]  (!%p4248_p6), %s4926_s13, 16, %s546_s22, [#allocation12]  }
  0xcb   : > { %s4093_s2 = smov [#allocation16]   ;;  %s3942_s16 = scalar_lea.hbm %s4928_s15, 16 }
  0xcc   : > { %s569_s7 = sshll.u32 %s4093_s2, 4  ;;  %p3943_p1 = scmp.ne.s32.totalorder %s4928_s15, %s3942_s16  ;;  %s570_s7 = int_to_ptr.vmem [resolvable:$true] %s569_s7 }
  0xcd   : > { %p3949_p0 = scmp.lt.u32.totalorder %s3942_s16, %s4928_s15 }
  0xce   : > { %p3945_p3 = pnand %p3943_p1, %p4262_p8 }
  0xd0   : > { %p3946_p13 = pneg %p3945_p3 }
  0xd2   : > { %p3951_p2 = pnand %p3949_p0, %p3946_p13 }
  0xd4   : > { %3954 = shalt.err (!%p3951_p2)
}
  0xd5   : > { %s3955_s22 = scalar_lea.vmem %s570_s7, 16  ;;  %s3962_s0 = scalar_lea.vmem %s570_s7, 32 }
  0xd6   : > { %p3956_p5 = scmp.ne.s32.totalorder %s570_s7, %s3955_s22  ;;  %p3963_p10 = scmp.lt.s32.totalorder %s570_s7, %s570_s7 }
  0xd7   : > { %p3964_p11 = scmp.lt.s32.totalorder %s3962_s0, %s3955_s22 }
  0xd8   : > { %p3958_p7 = pnand %p3956_p5, %p4262_p8 }
  0xd9   : > { %p3965_p12 = por %p3964_p11, %p3963_p10 }
  0xda   : > { %p3959_p9 = pneg %p3958_p7 }
  0xdc   : > { %p3966_p4 = pnand %p3965_p12, %p3959_p9 }
  0xde   : > { %3969 = shalt.err (!%p3966_p4)
}
  0xdf   : > { %3607 = dma.hbm_to_vmem [thread:$0]  (!%p4248_p6), %s4928_s15, 16, %s570_s7, [#allocation15]  }
  0xe0   : > { %s3136_s21 = sadd.s32 4294967294, %s4082_s30   ;;  %s4433_s24 = sadd.s32 1, %s4082_s30  }
  0xe1   : > { %s42_s18 = ssub.s32 %s4082_s30, %s4433_s24  ;;  %s45_s17 = sadd.s32 1, %s4078_s29 }
  0xe2   : > { %p43_p8 = scmp.eq.s32.totalorder %s42_s18, 0  ;;  %p52_p1 = scmp.ne.s32.totalorder %s4078_s29, %s4074_s28 }
  0xe3   : > { %p53_p3 = scmp.eq.s32.totalorder %s4082_s30, 0  ;;  %p58_p13 = scmp.ne.s32.totalorder %s4074_s28, %s4070_s27 }
  0xe4   : > { %s4444_s2 = scalar_select %p43_p8, %s4078_s29, %s45_s17  }
  0xe5   : > { %p4446_p0 = por %p53_p3, %p52_p1  ;;  %p4973_p2 = scmp.eq.s32.totalorder %s4230_s1, 0 }
  0xe6   : > { %p439_p5 = scmp.eq.s32.totalorder %s4230_s1, 1  ;;  %p445_p7 = scmp.eq.s32.totalorder %s3136_s21, 1 }
  0xe7   : > { %p4452_p6 = por %p4973_p2, %p58_p13  ;;  %p3624_p9 = scmp.lt.s32.totalorder %s4082_s30, 2 }
  0xe8   : > { %s586_s26 = sand.u32 1, %s4078_s29   ;;  %p4459_p10 = por %p439_p5, %p52_p1 }
  0xe9   : > { %p4463_p11 = por %p445_p7, %p58_p13  ;;  %s3147_s10 = sshll.u32 %s586_s26, 3 }
  0xea   : > { %s4975_s16 = scalar_select %p4459_p10, 1, 0 }
  0xeb   : > { %s4976_s19 = scalar_select %p4463_p11, 1, 0 }
  0xec   : > { %s3148_s12 = sshll.u32 %s4082_s30, 7  ;;  %s4977_s0 = sld [smem:[#allocation24_spill]] }
  0xed   : > { %s590_s11 = scalar_lea.vmem [#allocation2], %s3147_s10  ;;  %p4477_p12 = pnand %p3624_p9, %p4446_p0 }
  0xee   : > { %s597_s21 = sshll.u32 %s590_s11, 4  ;;  %s587_s17 = scalar_lea.sflag [#allocation3], %s586_s26  ;;  %s4473_s21 = int_to_ptr.vmem [resolvable:$true] %s597_s21 }
  0xef   : > { %p3972_p8 = pneg %p4477_p12 }
  0xf2   : > { %s4471_s25 = scalar_lea.hbm %s4977_s0, %s3148_s12  ;;  %s3975_s23 = scalar_lea.hbm %s4977_s0, 256 }
  0xf3   : > { %s3970_s6 = scalar_lea.hbm %s4471_s25, 128  ;;  %p3976_p13 = scmp.lt.u32.totalorder %s4471_s25, %s4977_s0 }
  0xf4   : > { %p3971_p4 = scmp.ne.s32.totalorder %s4471_s25, %s3970_s6  ;;  %p3977_p0 = scmp.lt.u32.totalorder %s3975_s23, %s3970_s6 }
  0xf5   : > { %p3979_p5 = scmp.lt.u32.totalorder %s3970_s6, %s4471_s25 }
  0xf6   : > { %p3973_p1 = pnand %p3972_p8, %p3971_p4  ;;  %p3978_p2 = por %p3977_p0, %p3976_p13 }
  0xf8   : > { %p3974_p3 = pneg %p3973_p1  ;;  %p3980_p7 = por %p3979_p5, %p3978_p2 }
  0xfa   : > { %p3981_p9 = pnand %p3980_p7, %p3974_p3 }
  0xfc   : > { %3984 = shalt.err (!%p3981_p9)
}
  0xfd   : > { %s3985_s26 = scalar_lea.vmem %s4473_s21, 128  ;;  %s4094_s11 = smov [#allocation2]  }
  0xfe   : > { %p3986_p4 = scmp.ne.s32.totalorder %s4473_s21, %s3985_s26  ;;  %s3990_s10 = sshll.u32 %s4094_s11, 4  ;;  %s3991_s10 = int_to_ptr.vmem [resolvable:$false] %s3990_s10 }
  0xff   : > { %s3992_s12 = scalar_lea.vmem %s3991_s10, 256  ;;  %p3993_p10 = scmp.lt.s32.totalorder %s4473_s21, %s3991_s10 }
 0x100   : > { %p3988_p1 = pnand %p3986_p4, %p3972_p8  ;;  %p3994_p13 = scmp.lt.s32.totalorder %s3992_s12, %s3985_s26 }
 0x102   : > { %p3989_p11 = pneg %p3988_p1  ;;  %p3995_p0 = por %p3994_p13, %p3993_p10 }
 0x104   : > { %p3996_p2 = pnand %p3995_p0, %p3989_p11 }
 0x106   : > { %3999 = shalt.err (!%p3996_p2)
}
 0x107   : > { %3611 = dma.hbm_to_vmem [thread:$0]  (!%p4477_p12), %s4471_s25, 128, %s4473_s21, %s587_s17  }
 0x108   : > { %p4979_p3 = scmp.ne.s32.totalorder %s4965_s20, 0 }
 0x109   : > { %s4509_s6 = sand.u32 (!%p4979_p3), 1, %s4074_s28  }
 0x10a   : > { %606 = sbr.rel (%p4979_p3) target bundleno = 6723 (0x1a43), region = 92  ;;  %s4941_s23 = sshll.u32 (!%p4979_p3), %s4509_s6, 3 }
 0x10b   : > { %s609_s9 = scalar_lea.sflag (!%p4979_p3), [#allocation3], %s4509_s6  ;;  %s612_s22 = scalar_lea.vmem (!%p4979_p3), [#allocation2], %s4941_s23 }
 0x111   : > { %4045 = dma.done.wait (%p4452_p6), %s609_s9, 128  }
 0x112   : > { %4047 = vsyncadd (%p4452_p6), %s609_s9, 4294967168  ;;  %p4980_p10 = scmp.eq.s32.totalorder %s4230_s1, 0 }
 0x114   : > { %4049 = dma.done.wait (%p4980_p10), [#allocation6], 528   ;;  %p4981_p11 = pmov %p4980_p10 }
 0x115   : > { %p4982_p12 = pmov %p4980_p10 }
 0x116   : > { %4051 = vsyncadd (%p4981_p11), [#allocation6], 4294966768 }
 0x117   : > { %4053 = dma.done.wait (%p4982_p12), [#allocation9], 528   ;;  %p4983_p8 = pmov %p4980_p10 }
 0x119   : > { %4055 = vsyncadd (%p4983_p8), [#allocation9], 4294966768  ;;  %p4984_p5 = pmov %p4983_p8 }
 0x11b   : > { %4057 = dma.done.wait (%p4984_p5), [#allocation12], 32   ;;  %p4985_p7 = pmov %p4984_p5 }
 0x11c   : > { %p4986_p6 = pmov %p4984_p5 }
 0x11d   : > { %4059 = vsyncadd (%p4985_p7), [#allocation12], 4294967264 }
 0x11e   : > { %4061 = dma.done.wait (%p4986_p6), [#allocation15], 1040   ;;  %p4987_p9 = pmov %p4984_p5 }
 0x11f   : > { %v4095_v0 = vmov 0.0|0.0   ;;  %vm4096_vm0 = vmmov 0   ;;  %v4097_v1 = vmov 0.0   ;;  %vm713_vm1 = vcmask 1043456   ;;  %s4988_s25 = sld [smem:[#allocation25_spill]]  ;;  %v699_v5 = vld [vmem:[%s612_s22] sm:$0xff] }
 0x120   : > { %4063 = vsyncadd (%p4987_p9), [#allocation15], 4294966256  ;;  %3483 = vmatprep.subr.bf16.mxu0 %v4095_v0  ;;  %3296 = vmatprep.mubr.msk.f32.mxu0 %vm4096_vm0, %v4097_v1  ;;  %vm4098_vm2 = vmmov 1   ;;  %vm709_vm4 = vcmask 97280   ;;  %v3160_v6 = vld [vmem:[#allocation5] ss:$0 sm:$0xff] }
 0x121   : > { %3315 = vmatprep.subr.mxu1 %v4097_v1  ;;  %3317 = vmatprep.mubr.msk.f32.mxu1 %vm4096_vm0, %v4097_v1  ;;  %vm3485_vm3 = vmpackc.low %vm713_vm1, %vm4098_vm2  ;;  %vm787_vm5 = vcmask 261120   ;;  %v3163_v20 = vld [vmem:[%s4917_s4] ss:$0 sm:$0xff]  ;;  %v833_v33 = vld [vmem:[#allocation7] sm:$0xff]  ;;  %s4099_s22 = smov 96   ;;  %s4100_s20 = smov 88  }
 0x122   : > { %v3164_v22 = vld [vmem:[%s4918_s5] ss:$0 sm:$0xff]  ;;  %v835_v36 = vld [vmem:[#allocation7 + $0x10] sm:$0xff]  ;;  %v836_v37 = vld [vmem:[#allocation7 + $0x18] sm:$0xff]  ;;  %s4951_s7 = smov 80   ;;  %s4949_s21 = smov 72  }
 0x123   : > { %v816_v24 = vld [vmem:[%s4916_s3] sm:$0xff]  ;;  %v4567_v38 = vpack.c.bf16 %v836_v37, %v835_v36  ;;  %v4574_v46 = vld [vmem:[#allocation8] ss:$0 sm:$0xff]  ;;  %vm943_vm6 = vcmask 64512   ;;  %s4948_s18 = smov 64   ;;  %s4104_s17 = smov 120  }
 0x124   : > { %v834_v34 = vld [vmem:[#allocation7 + $0x8] sm:$0xff]  ;;  %s4952_s26 = smov 112   ;;  %s4950_s11 = smov 104   ;;  %vm1617_vm7 = vcmask 130048   ;;  %vm1619_vm8 = vcmask 195584   ;;  %vm1835_vm10 = vcmask 523264  }
 0x125   : > { %v700_v2 = vld [vmem:[%s4988_s25] sm:$0xff]  ;;  %v701_v3 = vld [vmem:[%s4988_s25 + $0x8] sm:$0xf]  ;;  %v4563_v35 = vpack.c.bf16 %v834_v34, %v833_v33  ;;  %s4947_s10 = smov 48   ;;  %s4943_s12 = smov 40  }
 0x126   : > { %v3484_v4 = vpack.c.bf16 %v701_v3, %v700_v2  ;;  %s4942_s9 = smov 56   ;;  %s4946_s23 = smov 8  }
 0x127   : > { %p5007_p1 = scmp.ne.s32.totalorder %s4975_s16, 0 }
 0x128   : > { %3486 = vmatpush3.bf16.msk.msra.mxu0 %vm3485_vm3, %v3484_v4 }
 0x129   : > { %3487 = vmatprep.subr.bf16.mxu0 %v4095_v0 }
 0x12b   : > { %3297 = vmatmul.mubr.msk.f32.vlgmr.msra.gmra.mrb[0].mxu0 %vm709_vm4, %v699_v5 }
 0x12c   : > { %3307 = vmatprep.mubr.msk.f32.mxu0 %vm4096_vm0, %v4097_v1  ;;  %3489 = vmatpush3.bf16.msra.mxu0 %v4563_v35 }
 0x12d   : > { %3490 = vmatprep.subr.bf16.mxu0 %v4095_v0 }
 0x130   : > { %3492 = vmatpush3.bf16.msra.mxu0 %v4567_v38 }
 0x131   : > { %3310 = vmatprep.subr.mxu0 %v4097_v1 }
 0x1fe   : > { %v783_v7 = vpop.f32.mrb[0].mxu0 }
 0x1ff   : > { %v784_v8 = vadd.f32 %v3160_v6, %v783_v7  ;;  %v3298_v9 = vpop.f32.mrb[1].mxu0 }
 0x201   : > { %v788_v10 = vsel %vm787_vm5, %v784_v8, 0.0 }
 0x202   : > { %789 = vadd.xlane.f32.xlu0 %v788_v10 }
 0x28f   : > { %v790_v11 = vpop.xlane.xlu0 %789 }
 0x290   : > { %v792_v12 = vmul.f32 0.03125, %v790_v11 }
 0x292   : > { %v793_v13 = vsub.f32 %v784_v8, %v792_v12 }
 0x294   : > { %v794_v14 = vmul.f32 %v793_v13, %v793_v13 }
 0x296   : > { %v795_v15 = vsel %vm787_vm5, %v794_v14, 0.0 }
 0x297   : > { %796 = vadd.xlane.f32.xlu0 %v795_v15 }
 0x324   : > { %v797_v16 = vpop.xlane.xlu0 %796 }
 0x325   : > { %v798_v17 = vmul.f32 0.03125, %v797_v16 }
 0x327   : > { %v799_v18 = vadd.f32 1e-12, %v798_v17 }
 0x329   : > { %3694 = vrsqrt.f32 %v799_v18 }
 0x333   : > { %v3695_v19 = vpop.eup %3694 }
 0x334   : > { %v801_v21 = vmul.f32 %v3695_v19, %v793_v13 }
 0x336   : > { %v808_v23 = vmul.f32 %v3163_v20, %v801_v21 }
 0x338   : > { %v815_v25 = vadd.f32 %v3164_v22, %v808_v23 }
 0x33a   : > { %v817_v26 = vadd.f32 %v816_v24, %v815_v25 }
 0x33c   : > { %v818_v27 = vsel %vm787_vm5, %v817_v26, 0.0 }
 0x33d   : > { %819 = vadd.xlane.f32.xlu1 %v818_v27 }
 0x3ca   : > { %v820_v28 = vpop.xlane.xlu1 %819 }
 0x3cb   : > { %v821_v29 = vmul.f32 0.03125, %v820_v28 }
 0x3cd   : > { %v822_v30 = vsub.f32 %v817_v26, %v821_v29 }
 0x3cf   : > { %v823_v31 = vmul.f32 %v822_v30, %v822_v30 }
 0x3d1   : > { %v824_v32 = vsel %vm787_vm5, %v823_v31, 0.0 }
 0x3d2   : > { %825 = vadd.xlane.f32.xlu1 %v824_v32 }
 0x45f   : > { %v826_v39 = vpop.xlane.xlu1 %825 }
 0x460   : > { %v827_v40 = vmul.f32 0.03125, %v826_v39 }
 0x462   : > { %v828_v41 = vadd.f32 1e-12, %v827_v40 }
 0x464   : > { %3696 = vrsqrt.f32 %v828_v41 }
 0x46e   : > { %v3697_v42 = vpop.eup %3696 }
 0x46f   : > { %v830_v43 = vmul.f32 %v3697_v42, %v822_v30 }
 0x471   : > { %v831_v44 = vmul.f32 %v3163_v20, %v830_v43 }
 0x473   : > { %v832_v45 = vadd.f32 %v3164_v22, %v831_v44 }
 0x475   : > { %3308 = vmatmul.mubr.msk.f32.vlgmr.msra.gmra.mrb[2].mxu0 %vm787_vm5, %v832_v45 }
 0x476   : > { %3312 = vmatprep.mubr.msk.f32.mxu0 %vm4096_vm0, %v4097_v1 }
 0x548   : > { %v936_v47 = vpop.f32.mrb[2].mxu0 }
 0x549   : > { %v4577_v48 = vadd.f32 %v4574_v46, %v936_v47  ;;  %v3309_v49 = vpop.f32.mrb[3].mxu0 }
 0x54b   : > { %941 = vrot.lane.b32.xlu0 %v4577_v48, %s4099_s22 }
 0x54f   : > { %1108 = vrot.lane.b32.xlu0 %v4577_v48, %s4100_s20 }
 0x553   : > { %1274 = vrot.lane.b32.xlu0 %v4577_v48, %s4951_s7  ;;  %s4993_s7 = sld [smem:[#allocation34_spill]] }
 0x557   : > { %1440 = vrot.lane.b32.xlu0 %v4577_v48, %s4949_s21  ;;  %s5002_s21 = smov 8  }
 0x5bd   : > { %v942_v50 = vpop.permute.xlu0 %941 }
 0x5be   : > { %3311 = vmatpush3.xpose.msk.msra.mxu0 %vm943_vm6, %v942_v50 }
 0x5bf   : > { %3325 = vmatprep.subr.mxu0 %v4097_v1 }
 0x5c1   : > { %3313 = vmatmul.mubr.msk.f32.vlgmr.msra.gmra.mrb[4].mxu0 %vm943_vm6, %v4577_v48  ;;  %v1109_v63 = vpop.permute.xlu0 %1108 }
 0x5c2   : > { %3327 = vmatprep.mubr.msk.f32.mxu0 %vm4096_vm0, %v4097_v1 }
 0x5c5   : > { %v1275_v4 = vpop.permute.xlu0 %1274 }
 0x5c9   : > { %v1441_v6 = vpop.permute.xlu0 %1440 }
 0x694   : > { %v1014_v51 = vpop.f32.mrb[4].mxu0 }
 0x695   : > { %v1018_v52 = vmul.f32 0.35355338, %v1014_v51  ;;  %v3314_v53 = vpop.f32.mrb[5].mxu0 }
 0x696   : > { %v839_v53 = vld [vmem:[#allocation10 + $0x8] sm:$0xff] }
 0x697   : > { %v1019_v54 = vsel %vm943_vm6, %v1018_v52, -inf }
 0x698   : > { %1020 = vmax.xlane.f32.xlu1 %v1019_v54 }
 0x6a9   : > { %1030 = vrot.lane.b32.xlu1 %v4577_v48, %s4948_s18  ;;  %s4992_s18 = sld [smem:[#allocation33_spill]] }
 0x6ad   : > { %1106 = vrot.lane.b32.xlu1 %v4577_v48, %s4104_s17 }
 0x725   : > { %v1021_v55 = vpop.xlane.xlu1 %1020 }
 0x726   : > { %v1022_v56 = vsub.f32 %v1018_v52, %v1021_v55  ;;  %v838_v52 = vld [vmem:[#allocation10] sm:$0xff]  ;;  %v840_v55 = vld [vmem:[#allocation10 + $0x10] sm:$0xff] }
 0x727   : > { %v4648_v54 = vpack.c.bf16 %v839_v53, %v838_v52 }
 0x728   : > { %v1023_v57 = vmul.f32 1.442695, %v1022_v56  ;;  %v841_v56 = vld [vmem:[#allocation10 + $0x18] sm:$0xff] }
 0x729   : > { %v1031_v58 = vpop.permute.xlu1 %1030 }
 0x72a   : > { %3698 = vpow2.f32 %v1023_v57  ;;  %3316 = vmatpush3.msra.mxu1 %v1031_v58  ;;  %v4652_v57 = vpack.c.bf16 %v841_v56, %v840_v55 }
 0x72b   : > { %3320 = vmatprep.subr.mxu1 %v4097_v1 }
 0x72d   : > { %v1107_v61 = vpop.permute.xlu1 %1106 }
 0x734   : > { %v3699_v59 = vpop.eup %3698 }
 0x735   : > { %v1025_v60 = vsel %vm943_vm6, %v3699_v59, 0.0 }
 0x736   : > { %1026 = vadd.xlane.f32.xlu1 %v1025_v60 }
 0x747   : > { %1272 = vrot.lane.b32.xlu1 %v4577_v48, %s4952_s26  ;;  %s4994_s26 = smov 112  }
 0x74b   : > { %1438 = vrot.lane.b32.xlu1 %v4577_v48, %s4950_s11  ;;  %s4990_s11 = sld [smem:[#allocation30_spill]] }
 0x7c3   : > { %v1027_v62 = vpop.xlane.xlu1 %1026 }
 0x7c4   : > { %3700 = vrcp.f32 %v1027_v62 }
 0x7c7   : > { %v1273_v5 = vpop.permute.xlu1 %1272 }
 0x7cb   : > { %v1439_v7 = vpop.permute.xlu1 %1438 }
 0x7ce   : > { %v3701_v2 = vpop.eup %3700 }
 0x7cf   : > { %v1029_v3 = vmul.f32 %v3701_v2, %v3699_v59 }
 0x7d1   : > { %3318 = vmatmul.mubr.msk.f32.vlgmr.msra.gmra.mrb[0].mxu1 %vm943_vm6, %v1029_v3 }
 0x7d2   : > { %3321 = vmatpush3.xpose.msk.msra.mxu1 %vm943_vm6, %v1109_v63  ;;  %3322 = vmatprep.mubr.msk.f32.mxu1 %vm4096_vm0, %v4097_v1 }
 0x7d3   : > { %3330 = vmatprep.subr.mxu1 %v4097_v1 }
 0x7d5   : > { %3323 = vmatmul.mubr.msk.f32.vlgmr.msra.gmra.mrb[2].mxu1 %vm943_vm6, %v1107_v61 }
 0x7d6   : > { %3331 = vmatpush3.xpose.msk.msra.mxu1 %vm943_vm6, %v1275_v4  ;;  %3332 = vmatprep.mubr.msk.f32.mxu1 %vm4096_vm0, %v4097_v1 }
 0x7d7   : > { %3340 = vmatprep.subr.mxu1 %v4097_v1 }
 0x7d9   : > { %3333 = vmatmul.mubr.msk.f32.vlgmr.msra.gmra.mrb[4].mxu1 %vm943_vm6, %v1273_v5 }
 0x7da   : > { %3341 = vmatpush3.xpose.msk.msra.mxu1 %vm943_vm6, %v1441_v6  ;;  %3342 = vmatprep.mubr.msk.f32.mxu1 %vm4096_vm0, %v4097_v1 }
 0x7db   : > { %3493 = vmatprep.subr.bf16.mxu1 %v4095_v0 }
 0x7dd   : > { %3343 = vmatmul.mubr.msk.f32.vlgmr.msra.gmra.mrb[6].mxu1 %vm943_vm6, %v1439_v7 }
 0x7de   : > { %3358 = vmatprep.mubr.msk.f32.mxu1 %vm4096_vm0, %v4097_v1  ;;  %3495 = vmatpush3.bf16.msra.mxu1 %v4648_v54 }
 0x7df   : > { %3496 = vmatprep.subr.bf16.mxu1 %v4095_v0 }
 0x7e2   : > { %3498 = vmatpush3.bf16.msra.mxu1 %v4652_v57 }
 0x7e3   : > { %3505 = vmatprep.subr.bf16.mxu1 %v4095_v0 }
 0x8a4   : > { %v4622_v8 = vpop.f32.mrb[0].mxu1 }
 0x8a5   : > { %v3319_v9 = vpop.f32.mrb[1].mxu1 }
 0x8a8   : > { %v1180_v10 = vpop.f32.mrb[2].mxu1 }
 0x8a9   : > { %v1184_v11 = vmul.f32 0.35355338, %v1180_v10  ;;  %v3324_v12 = vpop.f32.mrb[3].mxu1  ;;  %v4666_v10 = vld [vmem:[#allocation11] ss:$0 sm:$0xff] }
 0x8ab   : > { %v1185_v13 = vsel %vm943_vm6, %v1184_v11, -inf }
 0x8ac   : > { %1186 = vmax.xlane.f32.xlu0 %v1185_v13  ;;  %v1346_v14 = vpop.f32.mrb[4].mxu1 }
 0x8ad   : > { %v1350_v15 = vmul.f32 0.35355338, %v1346_v14  ;;  %v3334_v16 = vpop.f32.mrb[5].mxu1 }
 0x8af   : > { %v1351_v17 = vsel %vm943_vm6, %v1350_v15, -inf }
 0x8b0   : > { %1352 = vmax.xlane.f32.xlu1 %v1351_v17  ;;  %v1512_v18 = vpop.f32.mrb[6].mxu1 }
 0x8b1   : > { %v1516_v19 = vmul.f32 0.35355338, %v1512_v18  ;;  %v3344_v20 = vpop.f32.mrb[7].mxu1 }
 0x8b3   : > { %v1517_v21 = vsel %vm943_vm6, %v1516_v19, -inf }
 0x8b4   : > { %1518 = vmax.xlane.f32.xlu0 %v1517_v21 }
 0x8c1   : > { %1362 = vrot.lane.b32.xlu1 %v4577_v48, %s4947_s10  ;;  %s4991_s10 = sld [smem:[#allocation31_spill]] }
 0x939   : > { %v1187_v22 = vpop.xlane.xlu0 %1186 }
 0x93a   : > { %v1188_v23 = vsub.f32 %v1184_v11, %v1187_v22 }
 0x93c   : > { %v1189_v24 = vmul.f32 1.442695, %v1188_v23 }
 0x93d   : > { %v1353_v25 = vpop.xlane.xlu1 %1352 }
 0x93e   : > { %3702 = vpow2.f32 %v1189_v24  ;;  %v1354_v26 = vsub.f32 %v1350_v15, %v1353_v25 }
 0x940   : > { %v1355_v27 = vmul.f32 1.442695, %v1354_v26 }
 0x941   : > { %v1519_v28 = vpop.xlane.xlu0 %1518  ;;  %v1363_v40 = vpop.permute.xlu1 %1362 }
 0x942   : > { %3704 = vpow2.f32 %v1355_v27  ;;  %v1520_v29 = vsub.f32 %v1516_v19, %v1519_v28 }
 0x944   : > { %v1521_v30 = vmul.f32 1.442695, %v1520_v29  ;;  %v4694_v29 = vld [vmem:[%s4990_s11] ss:$0 sm:$0xff]  ;;  %s5003_s11 = smov 16  }
 0x946   : > { %3706 = vpow2.f32 %v1521_v30 }
 0x948   : > { %v3703_v31 = vpop.eup %3702 }
 0x949   : > { %v1191_v32 = vsel %vm943_vm6, %v3703_v31, 0.0 }
 0x94a   : > { %1192 = vadd.xlane.f32.xlu0 %v1191_v32 }
 0x94c   : > { %v3705_v33 = vpop.eup %3704 }
 0x94d   : > { %v1357_v34 = vsel %vm943_vm6, %v3705_v33, 0.0 }
 0x94e   : > { %1358 = vadd.xlane.f32.xlu0 %v1357_v34  ;;  %v850_v34 = vld [vmem:[#allocation14] sm:$0xff] }
 0x950   : > { %v3707_v36 = vpop.eup %3706 }
 0x951   : > { %v1523_v37 = vsel %vm943_vm6, %v3707_v36, 0.0 }
 0x952   : > { %1524 = vadd.xlane.f32.xlu1 %v1523_v37 }
 0x963   : > { %1528 = vrot.lane.b32.xlu1 %v4577_v48, %s4943_s12  ;;  %s4944_s12 = smov 24  }
 0x964   : > { %1196 = vrot.lane.b32.xlu0 %v4577_v48, %s4942_s9  ;;  %s4945_s9 = smov 16  }
 0x9d7   : > { %v1193_v39 = vpop.xlane.xlu0 %1192 }
 0x9d8   : > { %3708 = vrcp.f32 %v1193_v39  ;;  %v852_v39 = vld [vmem:[#allocation14 + $0x10] sm:$0xff] }
 0x9db   : > { %v1359_v41 = vpop.xlane.xlu0 %1358 }
 0x9dc   : > { %3710 = vrcp.f32 %v1359_v41  ;;  %v854_v41 = vld [vmem:[#allocation14 + $0x20] sm:$0xff] }
 0x9df   : > { %v1197_v42 = vpop.permute.xlu0 %1196  ;;  %v1525_v43 = vpop.xlane.xlu1 %1524 }
 0x9e0   : > { %3712 = vrcp.f32 %v1525_v43  ;;  %3326 = vmatpush3.msra.mxu0 %v1197_v42  ;;  %v856_v43 = vld [vmem:[#allocation14 + $0x30] sm:$0xff] }
 0x9e1   : > { %3335 = vmatprep.subr.mxu0 %v4097_v1 }
 0x9e2   : > { %v3709_v44 = vpop.eup %3708 }
 0x9e3   : > { %v1195_v45 = vmul.f32 %v3709_v44, %v3703_v31  ;;  %v1529_v49 = vpop.permute.xlu1 %1528  ;;  %v4699_v31 = vld [vmem:[%s4991_s10] ss:$0 sm:$0xff]  ;;  %v857_v44 = vld [vmem:[#allocation14 + $0x38] sm:$0xff]  ;;  %s4995_s10 = smov 80  }
 0x9e5   : > { %3328 = vmatmul.mubr.msk.f32.vlgmr.msra.gmra.mrb[6].mxu0 %vm943_vm6, %v1195_v45  ;;  %v4725_v45 = vpack.c.bf16 %v857_v44, %v856_v43 }
 0x9e6   : > { %v3711_v47 = vpop.eup %3710  ;;  %3336 = vmatpush3.msra.mxu0 %v1363_v40  ;;  %3337 = vmatprep.mubr.msk.f32.mxu0 %vm4096_vm0, %v4097_v1  ;;  %v853_v40 = vld [vmem:[#allocation14 + $0x18] sm:$0xff] }
 0x9e7   : > { %v1361_v48 = vmul.f32 %v3711_v47, %v3705_v33  ;;  %3345 = vmatprep.subr.mxu0 %v4097_v1  ;;  %v4729_v47 = vld [vmem:[#allocation13] ss:$0 sm:$0xff] }
 0x9e9   : > { %3338 = vmatmul.mubr.msk.f32.vlgmr.msra.gmra.mrb[8].mxu0 %vm943_vm6, %v1361_v48 }
 0x9ea   : > { %v3713_v50 = vpop.eup %3712  ;;  %3346 = vmatpush3.msra.mxu0 %v1529_v49  ;;  %3347 = vmatprep.mubr.msk.f32.mxu0 %vm4096_vm0, %v4097_v1 }
 0x9eb   : > { %v1527_v51 = vmul.f32 %v3713_v50, %v3707_v36  ;;  %3499 = vmatprep.subr.bf16.mxu0 %v4095_v0  ;;  %v851_v36 = vld [vmem:[#allocation14 + $0x8] sm:$0xff] }
 0x9ec   : > { %v4713_v37 = vpack.c.bf16 %v851_v36, %v850_v34 }
 0x9ed   : > { %3348 = vmatmul.mubr.msk.f32.vlgmr.msra.gmra.mrb[10].mxu0 %vm943_vm6, %v1527_v51 }
 0x9ee   : > { %3369 = vmatprep.mubr.msk.f32.mxu0 %vm4096_vm0, %v4097_v1 }
 0xab8   : > { %v1268_v58 = vpop.f32.mrb[6].mxu0 }
 0xab9   : > { %1605 = vrot.lane.b32.xlu1 %v1268_v58, %s4946_s23  ;;  %v3329_v59 = vpop.f32.mrb[7].mxu0  ;;  %s4989_s23 = sld [smem:[#allocation32_spill]] }
 0xabc   : > { %v1434_v60 = vpop.f32.mrb[8].mxu0 }
 0xabd   : > { %1609 = vrot.lane.b32.xlu0 %v1434_v60, %s4945_s9  ;;  %v3339_v61 = vpop.f32.mrb[9].mxu0  ;;  %s4997_s9 = smov 72  }
 0xabf   : > { %v845_v19 = vld [vmem:[%s4989_s23] sm:$0xff]  ;;  %v846_v20 = vld [vmem:[%s4989_s23 + $0x8] sm:$0xff]  ;;  %v847_v22 = vld [vmem:[%s4989_s23 + $0x10] sm:$0xff] }
 0xac0   : > { %v1600_v62 = vpop.f32.mrb[10].mxu0  ;;  %v4677_v21 = vpack.c.bf16 %v846_v20, %v845_v19  ;;  %v848_v23 = vld [vmem:[%s4989_s23 + $0x18] sm:$0xff] }
 0xac1   : > { %1613 = vrot.lane.b32.xlu1 %v1600_v62, %s4944_s12  ;;  %v3349_v63 = vpop.f32.mrb[11].mxu0  ;;  %v4687_v24 = vpack.c.bf16 %v848_v23, %v847_v22  ;;  %s4996_s12 = smov 104  }
 0xac2   : > { %3501 = vmatpush3.bf16.msra.mxu0 %v4677_v21 }
 0xac3   : > { %3502 = vmatprep.subr.bf16.mxu0 %v4095_v0 }
 0xac6   : > { %3504 = vmatpush3.bf16.msra.mxu0 %v4687_v24 }
 0xac7   : > { %3517 = vmatprep.subr.bf16.mxu0 %v4095_v0 }
 0xb2b   : > { %v1606_v2 = vpop.permute.xlu1 %1605 }
 0xb2c   : > { %v1616_v4 = vsel %vm943_vm6, %v4622_v8, %v1606_v2 }
 0xb2f   : > { %v1610_v3 = vpop.permute.xlu0 %1609 }
 0xb30   : > { %v1618_v5 = vsel %vm1617_vm7, %v1616_v4, %v1610_v3 }
 0xb33   : > { %v1614_v6 = vpop.permute.xlu1 %1613 }
 0xb34   : > { %v1620_v7 = vsel %vm1619_vm8, %v1618_v5, %v1614_v6 }
 0xb35   : > { %3359 = vmatmul.mubr.msk.f32.vlgmr.msra.gmra.mrb[8].mxu1 %vm787_vm5, %v1620_v7 }
 0xb36   : > { %3388 = vmatprep.mubr.msk.f32.mxu1 %vm4096_vm0, %v4097_v1  ;;  %3507 = vmatpush3.bf16.msra.mxu1 %v4713_v37 }
 0xb37   : > { %3508 = vmatprep.subr.bf16.mxu1 %v4095_v0 }
 0xc08   : > { %v1690_v9 = vpop.f32.mrb[8].mxu1 }
 0xc09   : > { %v1694_v11 = vadd.f32 %v1690_v9, %v1620_v7  ;;  %v3360_v12 = vpop.f32.mrb[9].mxu1 }
 0xc0b   : > { %v1701_v13 = vadd.f32 %v4666_v10, %v1694_v11 }
 0xc0d   : > { %v1702_v14 = vsel %vm787_vm5, %v1701_v13, 0.0 }
 0xc0e   : > { %1703 = vadd.xlane.f32.xlu0 %v1702_v14 }
 0xc9b   : > { %v1704_v8 = vpop.xlane.xlu0 %1703 }
 0xc9c   : > { %v1705_v15 = vmul.f32 0.03125, %v1704_v8 }
 0xc9e   : > { %v1706_v16 = vsub.f32 %v1701_v13, %v1705_v15 }
 0xca0   : > { %v1707_v17 = vmul.f32 %v1706_v16, %v1706_v16 }
 0xca2   : > { %v1708_v18 = vsel %vm787_vm5, %v1707_v17, 0.0 }
 0xca3   : > { %1709 = vadd.xlane.f32.xlu1 %v1708_v18  ;;  %v4735_v18 = vld [vmem:[#allocation16] ss:$0 sm:$0xff] }
 0xd30   : > { %v1710_v25 = vpop.xlane.xlu1 %1709 }
 0xd31   : > { %v1711_v26 = vmul.f32 0.03125, %v1710_v25 }
 0xd33   : > { %v1712_v27 = vadd.f32 1e-12, %v1711_v26 }
 0xd35   : > { %3714 = vrsqrt.f32 %v1712_v27 }
 0xd3f   : > { %v3715_v28 = vpop.eup %3714 }
 0xd40   : > { %v1714_v30 = vmul.f32 %v3715_v28, %v1706_v16 }
 0xd42   : > { %v1721_v32 = vmul.f32 %v4694_v29, %v1714_v30 }
 0xd44   : > { %v4703_v33 = vadd.f32 %v4699_v31, %v1721_v32 }
 0xd46   : > { %3370 = vmatmul.mubr.msk.f32.vlgmr.msra.gmra.mrb[12].mxu0 %vm787_vm5, %v4703_v33 }
 0xd47   : > { %3519 = vmatpush3.bf16.msra.mxu0 %v4563_v35  ;;  %3399 = vmatprep.mubr.msk.f32.mxu0 %vm4096_vm0, %v4097_v1  ;;  %v4717_v35 = vpack.c.bf16 %v853_v40, %v852_v39 }
 0xd48   : > { %3520 = vmatprep.subr.bf16.mxu0 %v4095_v0 }
 0xd49   : > { %3510 = vmatpush3.bf16.msra.mxu1 %v4717_v35 }
 0xd4a   : > { %3511 = vmatprep.subr.bf16.mxu1 %v4095_v0 }
 0xd4b   : > { %3522 = vmatpush3.bf16.msra.mxu0 %v4567_v38  ;;  %v855_v38 = vld [vmem:[#allocation14 + $0x28] sm:$0xff] }
 0xd4c   : > { %3402 = vmatprep.subr.mxu0 %v4097_v1  ;;  %v4721_v42 = vpack.c.bf16 %v855_v38, %v854_v41  ;;  %v4749_v41 = vld [vmem:[%s4993_s7] ss:$0 sm:$0xff]  ;;  %s5004_s7 = smov 24  }
 0xd4e   : > { %3513 = vmatpush3.bf16.msra.mxu1 %v4721_v42 }
 0xd4f   : > { %3514 = vmatprep.subr.bf16.mxu1 %v4095_v0 }
 0xd52   : > { %3516 = vmatpush3.bf16.msra.mxu1 %v4725_v45 }
 0xd53   : > { %3412 = vmatprep.subr.mxu1 %v4097_v1 }
 0xe19   : > { %v1804_v48 = vpop.f32.mrb[12].mxu0 }
 0xe1a   : > { %v1805_v49 = vadd.f32 %v4729_v47, %v1804_v48  ;;  %v3371_v50 = vpop.f32.mrb[13].mxu0 }
 0xe1c   : > { %v1809_v51 = vmul.f32 0.70710677, %v1805_v49  ;;  %v1808_v8 = vmul.f32 0.5, %v1805_v49 }
 0xe1e   : > { %v1810_v52 = vand.u32 2147483647, %v1809_v51  ;;  %vm1830_vm9 = vcmp.ge.f32.partialorder %v1809_v51, 0.0 }
 0xe20   : > { %v1811_v53 = vmul.f32 0.3275911, %v1810_v52  ;;  %v1824_v56 = vsub.f32 0.0, %v1810_v52 }
 0xe22   : > { %v1812_v55 = vadd.f32 1.0, %v1811_v53  ;;  %v1825_v59 = vmul.f32 %v1824_v56, %v1810_v52 }
 0xe24   : > { %3716 = vrcp.f32 %v1812_v55  ;;  %v1826_v62 = vmul.f32 1.442695, %v1825_v59 }
 0xe26   : > { %3718 = vpow2.f32 %v1826_v62 }
 0xe2e   : > { %v3717_v58 = vpop.eup %3716 }
 0xe2f   : > { %v1815_v60 = vmul.f32 1.0614054, %v3717_v58 }
 0xe30   : > { %v3719_v9 = vpop.eup %3718 }
 0xe31   : > { %v1816_v61 = vadd.f32 -1.4531521, %v1815_v60 }
 0xe33   : > { %v1817_v63 = vmul.f32 %v3717_v58, %v1816_v61 }
 0xe35   : > { %v1818_v2 = vadd.f32 1.4214138, %v1817_v63 }
 0xe37   : > { %v1819_v3 = vmul.f32 %v3717_v58, %v1818_v2 }
 0xe39   : > { %v1820_v4 = vadd.f32 -0.28449672, %v1819_v3 }
 0xe3b   : > { %v1821_v5 = vmul.f32 %v3717_v58, %v1820_v4 }
 0xe3d   : > { %v1822_v6 = vadd.f32 0.2548296, %v1821_v5 }
 0xe3f   : > { %v1823_v7 = vmul.f32 %v3717_v58, %v1822_v6 }
 0xe41   : > { %v1828_v11 = vmul.f32 %v3719_v9, %v1823_v7 }
 0xe43   : > { %v1829_v12 = vsub.f32 1.0, %v1828_v11 }
 0xe45   : > { %v1831_v13 = vsub.f32 0.0, %v1829_v12 }
 0xe47   : > { %v1832_v14 = vsel %vm1830_vm9, %v1829_v12, %v1831_v13 }
 0xe48   : > { %v1833_v15 = vadd.f32 1.0, %v1832_v14 }
 0xe4a   : > { %v1834_v16 = vmul.f32 %v1833_v15, %v1808_v8 }
 0xe4c   : > { %3389 = vmatmul.mubr.msk.f32.vlgmr.msra.gmra.mrb[10].mxu1 %vm1835_vm10, %v1834_v16 }
 0xe4d   : > { %3414 = vmatprep.mubr.msk.f32.mxu1 %vm4096_vm0, %v4097_v1 }
 0xf1f   : > { %v1905_v17 = vpop.f32.mrb[10].mxu1 }
 0xf20   : > { %v1909_v19 = vadd.f32 %v1905_v17, %v4703_v33  ;;  %v3390_v20 = vpop.f32.mrb[11].mxu1  ;;  %v4744_v33 = vld [vmem:[%s4992_s18] ss:$0 sm:$0xff]  ;;  %s5001_s18 = smov 56  }
 0xf22   : > { %v1916_v22 = vadd.f32 %v4735_v18, %v1909_v19 }
 0xf24   : > { %v1917_v23 = vsel %vm787_vm5, %v1916_v22, 0.0 }
 0xf25   : > { %1918 = vadd.xlane.f32.xlu0 %v1917_v23 }
 0xfb2   : > { %v1919_v25 = vpop.xlane.xlu0 %1918 }
 0xfb3   : > { %v1920_v26 = vmul.f32 0.03125, %v1919_v25 }
 0xfb5   : > { %v1921_v27 = vsub.f32 %v1916_v22, %v1920_v26 }
 0xfb7   : > { %v1922_v28 = vmul.f32 %v1921_v27, %v1921_v27 }
 0xfb9   : > { %v1923_v30 = vsel %vm787_vm5, %v1922_v28, 0.0 }
 0xfba   : > { %1924 = vadd.xlane.f32.xlu0 %v1923_v30 }
0x1047   : > { %v1925_v32 = vpop.xlane.xlu0 %1924 }
0x1048   : > { %v1926_v34 = vmul.f32 0.03125, %v1925_v32 }
0x104a   : > { %v1927_v36 = vadd.f32 1e-12, %v1926_v34 }
0x104c   : > { %3720 = vrsqrt.f32 %v1927_v36 }
0x1056   : > { %v3721_v39 = vpop.eup %3720 }
0x1057   : > { %v1929_v40 = vmul.f32 %v3721_v39, %v1921_v27 }
0x1059   : > { %v1936_v38 = vmul.f32 %v4744_v33, %v1929_v40 }
0x105b   : > { %v1943_v43 = vadd.f32 %v4749_v41, %v1936_v38 }
0x105d   : > { %3400 = vmatmul.mubr.msk.f32.vlgmr.msra.gmra.mrb[14].mxu0 %vm787_vm5, %v1943_v43 }
0x105e   : > { %3404 = vmatprep.mubr.msk.f32.mxu0 %vm4096_vm0, %v4097_v1 }
0x1130   : > { %v2013_v44 = vpop.f32.mrb[14].mxu0 }
0x1131   : > { %v4757_v48 = vadd.f32 %v4574_v46, %v2013_v44  ;;  %v3401_v49 = vpop.f32.mrb[15].mxu0 }
0x1133   : > { %2184 = vrot.lane.b32.xlu1 %v4757_v48, %s4100_s20  ;;  %2018 = vrot.lane.b32.xlu0 %v4757_v48, %s4099_s22  ;;  %s4998_s22 = smov 64   ;;  %s4999_s20 = smov 48  }
0x1137   : > { %2182 = vrot.lane.b32.xlu1 %v4757_v48, %s4104_s17  ;;  %2348 = vrot.lane.b32.xlu0 %v4757_v48, %s4994_s26  ;;  %s5000_s17 = smov 40   ;;  %s3206_s26 = sshll.u32 %s4230_s1, 7 }
0x1138   : > { %s2977_s1 = scalar_lea.sflag [#allocation4], %s4509_s6 }
0x113b   : > { %2350 = vrot.lane.b32.xlu1 %v4757_v48, %s4995_s10  ;;  %2514 = vrot.lane.b32.xlu0 %v4757_v48, %s4996_s12  ;;  %s5005_s10 = sshll.u32 %s4509_s6, 3 }
0x113c   : > { %s696_s12 = scalar_lea.vmem [#allocation17], %s5005_s10 }
0x113f   : > { %2516 = vrot.lane.b32.xlu1 %v4757_v48, %s4997_s9  ;;  %s2990_s9 = sshll.u32 %s696_s12, 4  ;;  %s4870_s9 = int_to_ptr.vmem [resolvable:$true] %s2990_s9 }
0x11a5   : > { %v2185_v46 = vpop.permute.xlu1 %2184  ;;  %v2019_v50 = vpop.permute.xlu0 %2018 }
0x11a6   : > { %3403 = vmatpush3.xpose.msk.msra.mxu0 %vm943_vm6, %v2019_v50  ;;  %3413 = vmatpush3.xpose.msk.msra.mxu1 %vm943_vm6, %v2185_v46 }
0x11a7   : > { %3422 = vmatprep.subr.mxu1 %v4097_v1  ;;  %3407 = vmatprep.subr.mxu0 %v4097_v1 }
0x11a9   : > { %v2183_v51 = vpop.permute.xlu1 %2182  ;;  %3405 = vmatmul.mubr.msk.f32.vlgmr.msra.gmra.mrb[16].mxu0 %vm943_vm6, %v4757_v48  ;;  %v2349_v53 = vpop.permute.xlu0 %2348 }
0x11aa   : > { %3415 = vmatmul.mubr.msk.f32.vlgmr.msra.gmra.mrb[12].mxu1 %vm943_vm6, %v2183_v51  ;;  %3409 = vmatprep.mubr.msk.f32.mxu0 %vm4096_vm0, %v4097_v1 }
0x11ab   : > { %3424 = vmatprep.mubr.msk.f32.mxu1 %vm4096_vm0, %v4097_v1 }
0x11ad   : > { %v2351_v52 = vpop.permute.xlu1 %2350  ;;  %v2515_v56 = vpop.permute.xlu0 %2514 }
0x11ae   : > { %3423 = vmatpush3.xpose.msk.msra.mxu1 %vm943_vm6, %v2351_v52 }
0x11af   : > { %3432 = vmatprep.subr.mxu1 %v4097_v1 }
0x11b1   : > { %v2517_v55 = vpop.permute.xlu1 %2516  ;;  %3425 = vmatmul.mubr.msk.f32.vlgmr.msra.gmra.mrb[14].mxu1 %vm943_vm6, %v2349_v53 }
0x11b2   : > { %3433 = vmatpush3.xpose.msk.msra.mxu1 %vm943_vm6, %v2517_v55  ;;  %3434 = vmatprep.mubr.msk.f32.mxu1 %vm4096_vm0, %v4097_v1 }
0x11b3   : > { %3523 = vmatprep.subr.bf16.mxu1 %v4095_v0 }
0x11b5   : > { %3435 = vmatmul.mubr.msk.f32.vlgmr.msra.gmra.mrb[16].mxu1 %vm943_vm6, %v2515_v56 }
0x11b6   : > { %3525 = vmatpush3.bf16.msra.mxu1 %v4648_v54  ;;  %3450 = vmatprep.mubr.msk.f32.mxu1 %vm4096_vm0, %v4097_v1 }
0x11b7   : > { %3526 = vmatprep.subr.bf16.mxu1 %v4095_v0 }
0x11ba   : > { %3528 = vmatpush3.bf16.msra.mxu1 %v4652_v57 }
0x11bb   : > { %3535 = vmatprep.subr.bf16.mxu1 %v4095_v0 }
0x127c   : > { %v2090_v58 = vpop.f32.mrb[16].mxu0 }
0x127d   : > { %v2094_v59 = vmul.f32 0.35355338, %v2090_v58  ;;  %v3406_v60 = vpop.f32.mrb[17].mxu0  ;;  %v2256_v61 = vpop.f32.mrb[12].mxu1 }
0x127e   : > { %v2260_v62 = vmul.f32 0.35355338, %v2256_v61  ;;  %v3416_v63 = vpop.f32.mrb[13].mxu1 }
0x127f   : > { %v2095_v2 = vsel %vm943_vm6, %v2094_v59, -inf }
0x1280   : > { %2096 = vmax.xlane.f32.xlu1 %v2095_v2  ;;  %v2261_v54 = vsel %vm943_vm6, %v2260_v62, -inf }
0x1281   : > { %2262 = vmax.xlane.f32.xlu0 %v2261_v54 }
0x1284   : > { %v2422_v3 = vpop.f32.mrb[14].mxu1 }
0x1285   : > { %v2426_v4 = vmul.f32 0.35355338, %v2422_v3  ;;  %v3426_v5 = vpop.f32.mrb[15].mxu1 }
0x1287   : > { %v2427_v6 = vsel %vm943_vm6, %v2426_v4, -inf }
0x1288   : > { %2428 = vmax.xlane.f32.xlu0 %v2427_v6  ;;  %v2588_v57 = vpop.f32.mrb[16].mxu1 }
0x1289   : > { %v2592_v7 = vmul.f32 0.35355338, %v2588_v57  ;;  %v3436_v9 = vpop.f32.mrb[17].mxu1 }
0x128b   : > { %v2593_v11 = vsel %vm943_vm6, %v2592_v7, -inf }
0x128c   : > { %2594 = vmax.xlane.f32.xlu0 %v2593_v11 }
0x1291   : > { %2106 = vrot.lane.b32.xlu1 %v4757_v48, %s4998_s22 }
0x130d   : > { %v2097_v12 = vpop.xlane.xlu1 %2096 }
0x130e   : > { %v2098_v13 = vsub.f32 %v2094_v59, %v2097_v12  ;;  %v2263_v14 = vpop.xlane.xlu0 %2262 }
0x130f   : > { %v2264_v8 = vsub.f32 %v2260_v62, %v2263_v14 }
0x1310   : > { %v2099_v15 = vmul.f32 1.442695, %v2098_v13 }
0x1311   : > { %v2265_v16 = vmul.f32 1.442695, %v2264_v8  ;;  %v2107_v17 = vpop.permute.xlu1 %2106 }
0x1312   : > { %3722 = vpow2.f32 %v2099_v15  ;;  %3408 = vmatpush3.msra.mxu0 %v2107_v17 }
0x1313   : > { %3724 = vpow2.f32 %v2265_v16  ;;  %3417 = vmatprep.subr.mxu0 %v4097_v1 }
0x1315   : > { %v2429_v19 = vpop.xlane.xlu0 %2428 }
0x1316   : > { %v2430_v20 = vsub.f32 %v2426_v4, %v2429_v19 }
0x1318   : > { %v2431_v22 = vmul.f32 1.442695, %v2430_v20 }
0x1319   : > { %v2595_v23 = vpop.xlane.xlu0 %2594 }
0x131a   : > { %3726 = vpow2.f32 %v2431_v22  ;;  %v2596_v25 = vsub.f32 %v2592_v7, %v2595_v23 }
0x131c   : > { %v3723_v26 = vpop.eup %3722  ;;  %v2597_v27 = vmul.f32 1.442695, %v2596_v25 }
0x131d   : > { %v3725_v28 = vpop.eup %3724  ;;  %v2101_v30 = vsel %vm943_vm6, %v3723_v26, 0.0 }
0x131e   : > { %3728 = vpow2.f32 %v2597_v27  ;;  %2102 = vadd.xlane.f32.xlu1 %v2101_v30  ;;  %v2267_v32 = vsel %vm943_vm6, %v3725_v28, 0.0 }
0x131f   : > { %2268 = vadd.xlane.f32.xlu0 %v2267_v32 }
0x1324   : > { %v3727_v34 = vpop.eup %3726 }
0x1325   : > { %v2433_v36 = vsel %vm943_vm6, %v3727_v34, 0.0 }
0x1326   : > { %2434 = vadd.xlane.f32.xlu1 %v2433_v36 }
0x1328   : > { %v3729_v39 = vpop.eup %3728 }
0x1329   : > { %v2599_v40 = vsel %vm943_vm6, %v3729_v39, 0.0 }
0x132a   : > { %2600 = vadd.xlane.f32.xlu0 %v2599_v40 }
0x1337   : > { %2438 = vrot.lane.b32.xlu1 %v4757_v48, %s4999_s20 }
0x133b   : > { %2604 = vrot.lane.b32.xlu1 %v4757_v48, %s5000_s17  ;;  %s5006_s17 = sld [smem:[#allocation35_spill]] }
0x1340   : > { %2272 = vrot.lane.b32.xlu0 %v4757_v48, %s5001_s18 }
0x1341   : > { %s4868_s18 = scalar_lea.hbm %s5006_s17, %s3206_s26 }
0x13ab   : > { %v2103_v38 = vpop.xlane.xlu1 %2102 }
0x13ac   : > { %3730 = vrcp.f32 %v2103_v38  ;;  %v2269_v43 = vpop.xlane.xlu0 %2268 }
0x13ad   : > { %3732 = vrcp.f32 %v2269_v43 }
0x13b3   : > { %v2435_v44 = vpop.xlane.xlu1 %2434 }
0x13b4   : > { %3734 = vrcp.f32 %v2435_v44 }
0x13b6   : > { %v3731_v49 = vpop.eup %3730 }
0x13b7   : > { %v2105_v46 = vmul.f32 %v3731_v49, %v3723_v26  ;;  %v2601_v50 = vpop.xlane.xlu0 %2600  ;;  %v3733_v51 = vpop.eup %3732 }
0x13b8   : > { %3736 = vrcp.f32 %v2601_v50  ;;  %v2271_v52 = vmul.f32 %v3733_v51, %v3725_v28  ;;  %v2439_v53 = vpop.permute.xlu1 %2438 }
0x13b9   : > { %3410 = vmatmul.mubr.msk.f32.vlgmr.msra.gmra.mrb[18].mxu0 %vm943_vm6, %v2105_v46 }
0x13ba   : > { %3419 = vmatprep.mubr.msk.f32.mxu0 %vm4096_vm0, %v4097_v1 }
0x13bb   : > { %v2273_v55 = vpop.permute.xlu0 %2272 }
0x13bc   : > { %3418 = vmatpush3.msra.mxu0 %v2273_v55  ;;  %v2605_v58 = vpop.permute.xlu1 %2604 }
0x13bd   : > { %3420 = vmatmul.mubr.msk.f32.vlgmr.msra.gmra.mrb[20].mxu0 %vm943_vm6, %v2271_v52  ;;  %3427 = vmatprep.subr.mxu0 %v4097_v1 }
0x13be   : > { %v3735_v48 = vpop.eup %3734  ;;  %3428 = vmatpush3.msra.mxu0 %v2439_v53  ;;  %3429 = vmatprep.mubr.msk.f32.mxu0 %vm4096_vm0, %v4097_v1 }
0x13bf   : > { %v2437_v56 = vmul.f32 %v3735_v48, %v3727_v34  ;;  %3437 = vmatprep.subr.mxu0 %v4097_v1 }
0x13c1   : > { %3430 = vmatmul.mubr.msk.f32.vlgmr.msra.gmra.mrb[22].mxu0 %vm943_vm6, %v2437_v56 }
0x13c2   : > { %v3737_v59 = vpop.eup %3736  ;;  %3438 = vmatpush3.msra.mxu0 %v2605_v58  ;;  %3439 = vmatprep.mubr.msk.f32.mxu0 %vm4096_vm0, %v4097_v1 }
0x13c3   : > { %v2603_v60 = vmul.f32 %v3737_v59, %v3729_v39  ;;  %3529 = vmatprep.subr.bf16.mxu0 %v4095_v0 }
0x13c5   : > { %3440 = vmatmul.mubr.msk.f32.vlgmr.msra.gmra.mrb[24].mxu0 %vm943_vm6, %v2603_v60 }
0x13c6   : > { %3531 = vmatpush3.bf16.msra.mxu0 %v4677_v21  ;;  %3461 = vmatprep.mubr.msk.f32.mxu0 %vm4096_vm0, %v4097_v1 }
0x13c7   : > { %3532 = vmatprep.subr.bf16.mxu0 %v4095_v0 }
0x13ca   : > { %3534 = vmatpush3.bf16.msra.mxu0 %v4687_v24 }
0x148c   : > { %v2178_v61 = vpop.f32.mrb[18].mxu0 }
0x148d   : > { %v3411_v62 = vpop.f32.mrb[19].mxu0 }
0x1490   : > { %v2344_v63 = vpop.f32.mrb[20].mxu0 }
0x1491   : > { %2681 = vrot.lane.b32.xlu1 %v2344_v63, %s5002_s21  ;;  %v3421_v2 = vpop.f32.mrb[21].mxu0  ;;  %s4000_s21 = scalar_lea.vmem %s4870_s9, 128 }
0x1492   : > { %p4001_p4 = scmp.ne.s32.totalorder %s4870_s9, %s4000_s21 }
0x1494   : > { %v2510_v54 = vpop.f32.mrb[22].mxu0  ;;  %p4002_p13 = pnand %p4001_p4, %p5007_p1 }
0x1495   : > { %2685 = vrot.lane.b32.xlu0 %v2510_v54, %s5003_s11  ;;  %v3431_v3 = vpop.f32.mrb[23].mxu0  ;;  %s4113_s11 = smov [#allocation17]  }
0x1496   : > { %p4003_p0 = pneg %p4002_p13 }
0x1498   : > { %v2676_v4 = vpop.f32.mrb[24].mxu0 }
0x1499   : > { %2689 = vrot.lane.b32.xlu1 %v2676_v4, %s5004_s7  ;;  %v3441_v21 = vpop.f32.mrb[25].mxu0  ;;  %s4004_s7 = sshll.u32 %s4113_s11, 4  ;;  %s4005_s7 = int_to_ptr.vmem [resolvable:$false] %s4004_s7 }
0x149a   : > { %s4006_s10 = scalar_lea.vmem %s4005_s7, 256  ;;  %p4007_p2 = scmp.lt.s32.totalorder %s4870_s9, %s4005_s7 }
0x149b   : > { %p4008_p3 = scmp.lt.s32.totalorder %s4006_s10, %s4000_s21 }
0x149d   : > { %p4009_p10 = por %p4008_p3, %p4007_p2 }
0x149f   : > { %p4010_p11 = pnand %p4009_p10, %p4003_p0 }
0x1503   : > { %v2682_v5 = vpop.permute.xlu1 %2681 }
0x1504   : > { %v2692_v57 = vsel %vm943_vm6, %v2178_v61, %v2682_v5 }
0x1507   : > { %v2686_v6 = vpop.permute.xlu0 %2685 }
0x1508   : > { %v2693_v24 = vsel %vm1617_vm7, %v2692_v57, %v2686_v6 }
0x150b   : > { %v2690_v7 = vpop.permute.xlu1 %2689 }
0x150c   : > { %v2694_v9 = vsel %vm1619_vm8, %v2693_v24, %v2690_v7 }
0x150d   : > { %3451 = vmatmul.mubr.msk.f32.vlgmr.msra.gmra.mrb[18].mxu1 %vm787_vm5, %v2694_v9 }
0x150e   : > { %3537 = vmatpush3.bf16.msra.mxu1 %v4713_v37  ;;  %3480 = vmatprep.mubr.msk.f32.mxu1 %vm4096_vm0, %v4097_v1 }
0x150f   : > { %3538 = vmatprep.subr.bf16.mxu1 %v4095_v0 }
0x1512   : > { %3540 = vmatpush3.bf16.msra.mxu1 %v4717_v35 }
0x1513   : > { %3541 = vmatprep.subr.bf16.mxu1 %v4095_v0 }
0x1516   : > { %3543 = vmatpush3.bf16.msra.mxu1 %v4721_v42 }
0x1517   : > { %3544 = vmatprep.subr.bf16.mxu1 %v4095_v0 }
0x151a   : > { %3546 = vmatpush3.bf16.msra.mxu1 %v4725_v45 }
0x15e0   : > { %v2764_v11 = vpop.f32.mrb[18].mxu1 }
0x15e1   : > { %v2768_v12 = vadd.f32 %v2764_v11, %v2694_v9  ;;  %v3452_v13 = vpop.f32.mrb[19].mxu1 }
0x15e3   : > { %v2769_v37 = vadd.f32 %v4666_v10, %v2768_v12 }
0x15e5   : > { %v2770_v14 = vsel %vm787_vm5, %v2769_v37, 0.0 }
0x15e6   : > { %2771 = vadd.xlane.f32.xlu0 %v2770_v14 }
0x1673   : > { %v2772_v1 = vpop.xlane.xlu0 %2771 }
0x1674   : > { %v2773_v8 = vmul.f32 0.03125, %v2772_v1 }
0x1676   : > { %v2774_v15 = vsub.f32 %v2769_v37, %v2773_v8 }
0x1678   : > { %v2775_v35 = vmul.f32 %v2774_v15, %v2774_v15 }
0x167a   : > { %v2776_v16 = vsel %vm787_vm5, %v2775_v35, 0.0 }
0x167b   : > { %2777 = vadd.xlane.f32.xlu1 %v2776_v16 }
0x1708   : > { %v2778_v42 = vpop.xlane.xlu1 %2777 }
0x1709   : > { %v2779_v17 = vmul.f32 0.03125, %v2778_v42 }
0x170b   : > { %v2780_v0 = vadd.f32 1e-12, %v2779_v17 }
0x170d   : > { %3738 = vrsqrt.f32 %v2780_v0 }
0x1717   : > { %v3739_v45 = vpop.eup %3738 }
0x1718   : > { %v2782_v19 = vmul.f32 %v3739_v45, %v2774_v15 }
0x171a   : > { %v2783_v20 = vmul.f32 %v4694_v29, %v2782_v19 }
0x171c   : > { %v2784_v10 = vadd.f32 %v4699_v31, %v2783_v20 }
0x171e   : > { %3462 = vmatmul.mubr.msk.f32.vlgmr.msra.gmra.mrb[26].mxu0 %vm787_vm5, %v2784_v10 }
0x17f1   : > { %v2854_v22 = vpop.f32.mrb[26].mxu0 }
0x17f2   : > { %v2855_v23 = vadd.f32 %v4729_v47, %v2854_v22  ;;  %v3463_v25 = vpop.f32.mrb[27].mxu0 }
0x17f4   : > { %v2859_v26 = vmul.f32 0.70710677, %v2855_v23  ;;  %v2858_v48 = vmul.f32 0.5, %v2855_v23 }
0x17f6   : > { %v2860_v27 = vand.u32 2147483647, %v2859_v26  ;;  %vm2880_vm11 = vcmp.ge.f32.partialorder %v2859_v26, 0.0 }
0x17f8   : > { %v2861_v28 = vmul.f32 0.3275911, %v2860_v27  ;;  %v2874_v32 = vsub.f32 0.0, %v2860_v27 }
0x17fa   : > { %v2862_v30 = vadd.f32 1.0, %v2861_v28  ;;  %v2875_v36 = vmul.f32 %v2874_v32, %v2860_v27 }
0x17fc   : > { %3740 = vrcp.f32 %v2862_v30  ;;  %v2876_v38 = vmul.f32 1.442695, %v2875_v36 }
0x17fe   : > { %3742 = vpow2.f32 %v2876_v38 }
0x1806   : > { %v3741_v34 = vpop.eup %3740 }
0x1807   : > { %v2865_v39 = vmul.f32 1.0614054, %v3741_v34 }
0x1808   : > { %v3743_v50 = vpop.eup %3742 }
0x1809   : > { %v2866_v40 = vadd.f32 -1.4531521, %v2865_v39 }
0x180b   : > { %v2867_v29 = vmul.f32 %v3741_v34, %v2866_v40 }
0x180d   : > { %v2868_v43 = vadd.f32 1.4214138, %v2867_v29 }
0x180f   : > { %v2869_v31 = vmul.f32 %v3741_v34, %v2868_v43 }
0x1811   : > { %v2870_v44 = vadd.f32 -0.28449672, %v2869_v31 }
0x1813   : > { %v2871_v49 = vmul.f32 %v3741_v34, %v2870_v44 }
0x1815   : > { %v2872_v46 = vadd.f32 0.2548296, %v2871_v49 }
0x1817   : > { %v2873_v47 = vmul.f32 %v3741_v34, %v2872_v46 }
0x1819   : > { %v2878_v51 = vmul.f32 %v3743_v50, %v2873_v47 }
0x181b   : > { %v2879_v52 = vsub.f32 1.0, %v2878_v51 }
0x181d   : > { %v2881_v53 = vsub.f32 0.0, %v2879_v52 }
0x181f   : > { %v2882_v55 = vsel %vm2880_vm11, %v2879_v52, %v2881_v53 }
0x1820   : > { %v2883_v56 = vadd.f32 1.0, %v2882_v55 }
0x1822   : > { %v2884_v58 = vmul.f32 %v2883_v56, %v2858_v48 }
0x1824   : > { %3481 = vmatmul.mubr.msk.f32.vlgmr.msra.gmra.mrb[20].mxu1 %vm1835_vm10, %v2884_v58 }
0x18f7   : > { %v2954_v59 = vpop.f32.mrb[20].mxu1 }
0x18f8   : > { %v2958_v60 = vadd.f32 %v2954_v59, %v2784_v10  ;;  %v3482_v61 = vpop.f32.mrb[21].mxu1 }
0x18fa   : > { %v2959_v62 = vadd.f32 %v4735_v18, %v2958_v60 }
0x18fc   : > { %v2960_v63 = vsel %vm787_vm5, %v2959_v62, 0.0 }
0x18fd   : > { %2961 = vadd.xlane.f32.xlu0 %v2960_v63 }
0x198a   : > { %v2962_v2 = vpop.xlane.xlu0 %2961 }
0x198b   : > { %v2963_v54 = vmul.f32 0.03125, %v2962_v2 }
0x198d   : > { %v2964_v3 = vsub.f32 %v2959_v62, %v2963_v54 }
0x198f   : > { %v2965_v4 = vmul.f32 %v2964_v3, %v2964_v3 }
0x1991   : > { %v2966_v21 = vsel %vm787_vm5, %v2965_v4, 0.0 }
0x1992   : > { %2967 = vadd.xlane.f32.xlu0 %v2966_v21 }
0x1a1f   : > { %v2968_v5 = vpop.xlane.xlu0 %2967 }
0x1a20   : > { %v2969_v6 = vmul.f32 0.03125, %v2968_v5 }
0x1a22   : > { %v2970_v57 = vadd.f32 1e-12, %v2969_v6 }
0x1a24   : > { %3744 = vrsqrt.f32 %v2970_v57 }
0x1a2e   : > { %v3745_v24 = vpop.eup %3744 }
0x1a2f   : > { %v2972_v7 = vmul.f32 %v3745_v24, %v2964_v3 }
0x1a31   : > { %v2973_v18 = vmul.f32 %v4744_v33, %v2972_v7 }
0x1a33   : > { %v2974_v9 = vadd.f32 %v4749_v41, %v2973_v18 }
0x1a35   : > { %2975 = vst.msk [vmem:[%s696_s12] sm:$0xff] %vm787_vm5, %v2974_v9 }
0x1a36   : > { %4013 = shalt.err (!%p4010_p11)
}
0x1a37   : > { %s4014_s6 = scalar_lea.hbm %s4868_s18, 128  ;;  %s4018_s22 = scalar_lea.hbm %s5006_s17, 256 }
0x1a38   : > { %p4015_p12 = scmp.ne.s32.totalorder %s4868_s18, %s4014_s6  ;;  %p4019_p7 = scmp.lt.u32.totalorder %s4868_s18, %s5006_s17 }
0x1a39   : > { %p4020_p6 = scmp.lt.u32.totalorder %s4018_s22, %s4014_s6  ;;  %p4022_p4 = scmp.lt.u32.totalorder %s4014_s6, %s4868_s18 }
0x1a3a   : > { %p4016_p8 = pnand %p4015_p12, %p5007_p1 }
0x1a3b   : > { %p4021_p9 = por %p4020_p6, %p4019_p7 }
0x1a3c   : > { %p4017_p5 = pneg %p4016_p8 }
0x1a3d   : > { %p4023_p13 = por %p4022_p4, %p4021_p9 }
0x1a3f   : > { %p4024_p0 = pnand %p4023_p13, %p4017_p5 }
0x1a41   : > { %4027 = shalt.err (!%p4024_p0)
}
0x1a42   : > { %3581 = dma.vmem_to_hbm [thread:$0]  (%p5007_p1), %s4870_s9, 128, %s4868_s18, %s2977_s1  }
0x1a43 PF: > { %s3002_s21 = sand.u32 1, %s4070_s27   ;;  %p5008_p2 = scmp.ne.s32.totalorder %s4976_s19, 0 }
0x1a44   : > { %p5009_p3 = scmp.ge.s32.totalorder %s4082_s30, 2  ;;  %s3003_s7 = scalar_lea.sflag [#allocation4], %s3002_s21 }
0x1a46   : > { %p3613_p10 = pnand %p5009_p3, %p5008_p2 }
0x1a48   : > { %4065 = dma.done.wait (!%p3613_p10), %s3003_s7, 128  }
0x1a49   : > { %4067 = vsyncadd (!%p3613_p10), %s3003_s7, 4294967168  ;;  %p35_p11 = scmp.ge.s32.totalorder %s4433_s24, 4   ;;  %s5010_s27 = smov %s4074_s28 }
0x1a4a   : > { %s5011_s28 = smov %s4078_s29  ;;  %s5012_s29 = smov %s4444_s2 }
0x1a4b   : > { %s5013_s30 = smov %s4433_s24  ;;  %37 = sbr.rel (!%p35_p11) target bundleno = 22 (0x16), region = 169 }
0x1a52   :  { %3008 = vsyncpa [#allocation3], 1 }
0x1a53   :  { %3010 = vsyncpa [#allocation3 + $0x1], 1 }
0x1a54   :  { %3011 = vsyncpa [#allocation6], 1 }
0x1a55   :  { %3012 = vsyncpa [#allocation9], 1 }
0x1a56   :  { %3013 = vsyncpa [#allocation12], 1 }
0x1a57   :  { %3014 = vsyncpa [#allocation15], 1 }
0x1a58   :  { %3015 = vsyncpa [#allocation4], 1 }
0x1a59   :  { %3017 = vsyncpa [#allocation4 + $0x1], 1 }

</bundles_post_ra>
